<compile_context>
chip_gen: v6e
topology: v6e:2x2x1
jax: 0.10.0
libtpu: 0.0.40
codegen_flags: <defaults>
</compile_context>

<pallas_src>
import functools

import numpy as np
import jax
import jax.numpy as jnp
from jax import lax
from jax.experimental import pallas as pl
from jax.experimental.pallas import tpu as pltpu


def _round_up(n, m):
    return ((n + m - 1) // m) * m


# ----------------------------------------------------------------------------
# Sinusoid position encoding table (matches get_sinusoid_encoding_table).
# ----------------------------------------------------------------------------
def get_sinusoid_encoding_table(n_position: int, d_hid: int) -> jnp.ndarray:
    pos = np.arange(n_position, dtype=np.float32)[:, None]
    hid = np.arange(d_hid, dtype=np.float32)[None, :]
    angle = pos / np.power(10000.0, 2.0 * np.floor(hid / 2.0) / d_hid)
    table = np.zeros((n_position, d_hid), dtype=np.float32)
    table[:, 0::2] = np.sin(angle[:, 0::2])   # even hidden indices -> sin
    table[:, 1::2] = np.cos(angle[:, 1::2])   # odd hidden indices  -> cos
    return jnp.asarray(table, dtype=jnp.float32)


# ----------------------------------------------------------------------------
# Fused encoder-stack kernel: grid = (batch tiles [parallel], layers [arbitrary]).
# ----------------------------------------------------------------------------
def encoder_stack_kernel(x_ref, kbias_ref, qmul_ref, wqkv_ref, wo_ref, cw1_ref,
                         cw2_ref, vecs_ref, out_ref, ypad_ref, *,
                         n_head, d_model, conv_ks):
    f32, bf16 = jnp.float32, jnp.bfloat16
    layer = pl.program_id(1)

    R, Dp = out_ref.shape                     # rows per batch tile, padded model width
    Bt = kbias_ref.shape[0]                   # sequences per batch tile
    S = kbias_ref.shape[2]                    # sequence length
    EQ = wqkv_ref.shape[1]                    # 3 * n_head * HP
    HP = EQ // (3 * n_head)                   # per-head padded width (128)
    DIp = cw2_ref.shape[0]                    # padded FFN hidden width
    conv_pad = (conv_ks - 1) // 2
    inv_d = 1.0 / float(d_model)

    # Layer 0 (once per batch tile): seed the resident activation (= out_ref) and zero
    # the conv halo; the interior is overwritten every layer, the halo stays zero.
    @pl.when(layer == 0)
    def _():
        out_ref[...] = x_ref[...]
        ypad_ref[...] = jnp.zeros_like(ypad_ref)

    x = out_ref[...]                          # (R, Dp) f32, resident across layers
    kbias = kbias_ref[...]                    # (Bt, 1, S)  0 / -1e9 additive key mask
    qmul = qmul_ref[...]                      # (R, 1)      1 / 0 query-row gate

    # packed per-layer vectors: 0=bqkv 1=bo 2=ln1_g 3=ln1_b 4=cb1 5=cb2 6=ln2_g 7=ln2_b
    b_qkv = vecs_ref[0:1, 0:EQ]
    b_o = vecs_ref[1:2, 0:Dp]
    g1 = vecs_ref[2:3, 0:Dp]
    be1 = vecs_ref[3:4, 0:Dp]
    cb1 = vecs_ref[4:5, 0:DIp]
    cb2 = vecs_ref[5:6, 0:Dp]
    g2 = vecs_ref[6:7, 0:Dp]
    be2 = vecs_ref[7:8, 0:Dp]

    def layer_norm(t, g, b):
        # Masked LayerNorm over a zero-padded lane dim: divide by the TRUE d_model and
        # use E[x^2] - mu^2 so pad lanes (exact zeros) never enter the statistics.
        mu = jnp.sum(t, axis=-1, keepdims=True) * inv_d
        var = jnp.sum(t * t, axis=-1, keepdims=True) * inv_d - mu * mu
        var = jnp.maximum(var, 0.0)
        # g/b are zero on pad lanes -> pad lanes of the result stay exactly zero.
        return (t - mu) * lax.rsqrt(var + 1e-5) * g + b

    # ---- multi-head self-attention -----------------------------------------
    # single fused QKV projection (bf16 operands, f32 accumulate); 1/sqrt(d_k) is
    # already folded into Wq / bq by the wrapper.
    qkv = jnp.dot(x.astype(bf16), wqkv_ref[...], preferred_element_type=f32) + b_qkv

    heads = []
    for h in range(n_head):                   # tiny static loop; all slices 128-aligned
        qh = qkv[:, h * HP:(h + 1) * HP].reshape(Bt, S, HP).astype(bf16)
        kh = qkv[:, (n_head + h) * HP:(n_head + h + 1) * HP].reshape(Bt, S, HP).astype(bf16)
        vh = qkv[:, (2 * n_head + h) * HP:(2 * n_head + h + 1) * HP].reshape(Bt, S, HP).astype(bf16)
        s = lax.dot_general(qh, kh, (((2,), (2,)), ((0,), (0,))),
                            preferred_element_type=f32)             # (Bt, S, S)
        s = s + kbias                          # additive -1e9 bias at padded keys
        s = s - jnp.max(s, axis=-1, keepdims=True)
        e = jnp.exp(s)
        p = e * pl.reciprocal(jnp.sum(e, axis=-1, keepdims=True), approx=False)
        head = lax.dot_general(p.astype(bf16), vh, (((2,), (1,)), ((0,), (0,))),
                               preferred_element_type=f32)           # (Bt, S, HP)
        heads.append(head.reshape(R, HP))

    cat = jnp.concatenate(heads, axis=-1).astype(bf16)               # (R, n_head*HP)
    attn_out = jnp.dot(cat, wo_ref[...], preferred_element_type=f32) + b_o

    y = layer_norm(attn_out + x, g1, be1) * qmul                     # residual + LN + mask

    # ---- position-wise FFN: Conv1d(k=9,pad=4) -> ReLU -> Conv1d(k=1) via im2col ----
    # interior of the persistent padded buffer <- masked activation; halo stays zero.
    ypad_ref[:, conv_pad:conv_pad + S, :] = y.reshape(Bt, S, Dp)
    im2col = jnp.concatenate([ypad_ref[:, t:t + S, :] for t in range(conv_ks)],
                             axis=-1).reshape(R, conv_ks * Dp)       # static tap offsets
    hid = jnp.dot(im2col.astype(bf16), cw1_ref[...], preferred_element_type=f32)
    hid = jnp.maximum(hid + cb1, 0.0)                                # bias folded w/ ReLU
    z = jnp.dot(hid.astype(bf16), cw2_ref[...], preferred_element_type=f32) + cb2

    z = layer_norm(z + y, g2, be2) * qmul
    out_ref[...] = z                                                  # carries to next layer


# ----------------------------------------------------------------------------
# Weight packing: layer-stacked, lane-padded, bf16 matmul operands.
# ----------------------------------------------------------------------------
def _pad2(a, r, c):
    return jnp.pad(a, ((0, r - a.shape[0]), (0, c - a.shape[1])))


def _pad1(a, n):
    return jnp.pad(a, (0, n - a.shape[0]))


_VEC_ROWS = 8


def pack_layer_params(layers, *, n_head, d_k, d_v, d_model, d_inner, Dp, HP, DIp):
    """Stack per-layer weights with a leading layer axis, zero-pad every matmul dim up
    to a multiple of 128 lanes, fold 1/sqrt(d_k) into Wq/bq, cast matmul operands to
    bf16, and pack all 1-D vectors into one (n_layers, 8, Vmax) f32 array."""
    inv_temp = 1.0 / (float(d_k) ** 0.5)
    H = n_head
    conv_ks = layers[0]["cw1"].shape[0]

    def heads_cols(w, dh, scale=1.0):
        # (d_model, H*dh) -> (Dp, H*HP): head h's dh columns land at lane offset h*HP.
        return jnp.concatenate(
            [_pad2(w[:, h * dh:(h + 1) * dh] * scale, Dp, HP) for h in range(H)], axis=1)

    def heads_rows(w, dh):
        # (H*dh, d_model) -> (H*HP, Dp): head h's rows land at row offset h*HP.
        return jnp.concatenate(
            [_pad2(w[h * dh:(h + 1) * dh, :], HP, Dp) for h in range(H)], axis=0)

    def heads_vec(b, dh, scale=1.0):
        return jnp.concatenate([_pad1(b[h * dh:(h + 1) * dh] * scale, HP) for h in range(H)])

    wqkv = jnp.stack([jnp.concatenate([heads_cols(p["wq"], d_k, inv_temp),
                                       heads_cols(p["wk"], d_k),
                                       heads_cols(p["wv"], d_v)], axis=1)
                      for p in layers]).astype(jnp.bfloat16)          # (L, Dp, 3*H*HP)
    wo = jnp.stack([heads_rows(p["wo"], d_v) for p in layers]).astype(jnp.bfloat16)
    cw1 = jnp.stack([
        jnp.pad(p["cw1"], ((0, 0), (0, Dp - d_model), (0, DIp - d_inner))
                ).reshape(conv_ks * Dp, DIp)
        for p in layers]).astype(jnp.bfloat16)                        # (L, ks*Dp, DIp)
    cw2 = jnp.stack([_pad2(p["cw2"], DIp, Dp) for p in layers]).astype(jnp.bfloat16)

    vmax = max(3 * H * HP, DIp, Dp)

    def row(v):
        return _pad1(v, vmax)

    vecs = jnp.stack([
        jnp.stack([row(jnp.concatenate([heads_vec(p["bq"], d_k, inv_temp),
                                        heads_vec(p["bk"], d_k),
                                        heads_vec(p["bv"], d_v)])),
                   row(_pad1(p["bo"], Dp)),
                   row(_pad1(p["ln1_g"], Dp)), row(_pad1(p["ln1_b"], Dp)),
                   row(_pad1(p["cb1"], DIp)), row(_pad1(p["cb2"], Dp)),
                   row(_pad1(p["ln2_g"], Dp)), row(_pad1(p["ln2_b"], Dp))])
        for p in layers]).astype(jnp.float32)                         # (L, 8, vmax)
    return wqkv, wo, cw1, cw2, vecs


# ----------------------------------------------------------------------------
# Encoder forward (glue: embedding gather + pos-enc add, then fused FFT stack).
# ----------------------------------------------------------------------------
def encoder_forward(src_seq, mask, params, *, n_head, d_k, d_v, num_batch_tiles=1):
    B, S = src_seq.shape
    D = params["emb"].shape[1]
    d_inner = params["layers"][0]["cw1"].shape[2]
    conv_ks = params["layers"][0]["cw1"].shape[0]
    conv_pad = (conv_ks - 1) // 2
    L = len(params["layers"])

    assert B % num_batch_tiles == 0
    Bt = B // num_batch_tiles
    R = Bt * S

    Dp = _round_up(D, 128)                   # padded model/lane width
    HP = _round_up(max(d_k, d_v), 128)       # padded per-head width
    DIp = _round_up(d_inner, 128)            # padded FFN hidden width

    # Embedding gather + positional encoding (cheap XLA ops), zero-padded to Dp lanes.
    x = params["emb"][src_seq] + params["pos"][:S][None, :, :]        # (B, S, D)
    xf = jnp.pad(x.reshape(B * S, D).astype(jnp.float32), ((0, 0), (0, Dp - D)))
    kbias = (-1e9) * mask.astype(jnp.float32)[:, None, :]             # (B, 1, S)
    qmul = (1.0 - mask.astype(jnp.float32)).reshape(B * S, 1)         # (B*S, 1)

    wqkv, wo, cw1, cw2, vecs = pack_layer_params(
        params["layers"], n_head=n_head, d_k=d_k, d_v=d_v, d_model=D,
        d_inner=d_inner, Dp=Dp, HP=HP, DIp=DIp)
    EQ = wqkv.shape[2]
    vmax = vecs.shape[2]

    try:    # scoped-VMEM budget: ~85% of physical, capped at 100 MiB (fits v5e..v7x)
        vmem_limit = min(int(0.85 * pltpu.get_tpu_info().vmem_capacity_bytes),
                         100 * 1024 * 1024)
    except Exception:
        vmem_limit = 48 * 1024 * 1024

    kernel = functools.partial(encoder_stack_kernel, n_head=n_head, d_model=D,
                               conv_ks=conv_ks)

    out = pl.pallas_call(
        kernel,
        out_shape=jax.ShapeDtypeStruct((B * S, Dp), jnp.float32),
        grid=(num_batch_tiles, L),           # (parallel batch tiles, sequential layers)
        in_specs=[
            pl.BlockSpec((R, Dp), lambda bt, l: (bt, 0)),             # x (layer-0 seed)
            pl.BlockSpec((Bt, 1, S), lambda bt, l: (bt, 0, 0)),       # additive key mask
            pl.BlockSpec((R, 1), lambda bt, l: (bt, 0)),              # query-row gate
            pl.BlockSpec((None, Dp, EQ), lambda bt, l: (l, 0, 0)),    # fused Wqkv (bf16)
            pl.BlockSpec((None, n_head * HP, Dp), lambda bt, l: (l, 0, 0)),
            pl.BlockSpec((None, conv_ks * Dp, DIp), lambda bt, l: (l, 0, 0)),
            pl.BlockSpec((None, DIp, Dp), lambda bt, l: (l, 0, 0)),
            pl.BlockSpec((None, _VEC_ROWS, vmax), lambda bt, l: (l, 0, 0)),
        ],
        out_specs=pl.BlockSpec((R, Dp), lambda bt, l: (bt, 0)),       # resident activation
        scratch_shapes=[
            pltpu.VMEM((Bt, S + 2 * conv_pad, Dp), jnp.float32),      # padded conv buffer
        ],
        compiler_params=pltpu.CompilerParams(
            dimension_semantics=("parallel", "arbitrary"),
            vmem_limit_bytes=vmem_limit),
    )(xf, kbias, qmul, wqkv, wo, cw1, cw2, vecs)
    return out.reshape(B, S, Dp)[:, :, :D]


# ----------------------------------------------------------------------------
# Deterministic parameter init (synthetic; mirrors the module's shapes).
# ----------------------------------------------------------------------------
def init_params(key, *, n_vocab, n_pos, d_model, d_inner, n_layers, n_head, d_k, d_v,
                conv_ks=9):
    keys = jax.random.split(key, 1 + n_layers)

    def nrm(k, shape):
        return 0.05 * jax.random.normal(k, shape, jnp.float32)

    emb = nrm(keys[0], (n_vocab, d_model))
    emb = emb.at[0].set(0.0)            # padding_idx = Constants.PAD = 0
    pos = get_sinusoid_encoding_table(n_pos, d_model)

    layers = []
    for li in range(n_layers):
        ks = jax.random.split(keys[1 + li], 6)
        layers.append(dict(
            wq=nrm(ks[0], (d_model, n_head * d_k)), bq=jnp.zeros((n_head * d_k,), jnp.float32),
            wk=nrm(ks[1], (d_model, n_head * d_k)), bk=jnp.zeros((n_head * d_k,), jnp.float32),
            wv=nrm(ks[2], (d_model, n_head * d_v)), bv=jnp.zeros((n_head * d_v,), jnp.float32),
            wo=nrm(ks[3], (n_head * d_v, d_model)), bo=jnp.zeros((d_model,), jnp.float32),
            ln1_g=jnp.ones((d_model,), jnp.float32), ln1_b=jnp.zeros((d_model,), jnp.float32),
            cw1=nrm(ks[4], (conv_ks, d_model, d_inner)),      # Conv1d(d_model,d_inner,9)
            cb1=0.01 * jnp.ones((d_inner,), jnp.float32),
            cw2=nrm(ks[5], (d_inner, d_model)),               # Conv1d(d_inner,d_model,1)
            cb2=0.01 * jnp.ones((d_model,), jnp.float32),
            ln2_g=jnp.ones((d_model,), jnp.float32), ln2_b=jnp.zeros((d_model,), jnp.float32),
        ))
    return dict(emb=emb, pos=pos, layers=layers)


# ----------------------------------------------------------------------------
# Pure-JAX f32 reference (same math as the PyTorch module) for correctness.
# ----------------------------------------------------------------------------
def ref_encoder(src_seq, mask, params, *, n_head, d_k, d_v):
    B, S = src_seq.shape
    x = params["emb"][src_seq] + params["pos"][:S][None, :, :]
    km = mask[:, None, :]
    qm = mask[:, :, None]

    def ln(t, g, b):
        mu = jnp.mean(t, axis=-1, keepdims=True)
        var = jnp.mean(jnp.square(t - mu), axis=-1, keepdims=True)
        return (t - mu) * lax.rsqrt(var + 1e-5) * g + b

    for p in params["layers"]:
        q = (x @ p["wq"] + p["bq"]).reshape(B, S, n_head, d_k)
        k = (x @ p["wk"] + p["bk"]).reshape(B, S, n_head, d_k)
        v = (x @ p["wv"] + p["bv"]).reshape(B, S, n_head, d_v)
        scores = jnp.einsum("bqhd,bkhd->bhqk", q, k) / (d_k ** 0.5)
        scores = jnp.where(km[:, None, :, :], -jnp.inf, scores)
        attn = jax.nn.softmax(scores, axis=-1)
        o = jnp.einsum("bhqk,bkhd->bqhd", attn, v).reshape(B, S, n_head * d_v)
        o = o @ p["wo"] + p["bo"]
        y = ln(o + x, p["ln1_g"], p["ln1_b"])
        y = jnp.where(qm, 0.0, y)

        ks_ = p["cw1"].shape[0]
        pad = (ks_ - 1) // 2
        yp = jnp.pad(y, ((0, 0), (pad, pad), (0, 0)))
        h = jnp.zeros((B, S, p["cw1"].shape[2]), jnp.float32) + p["cb1"]
        for t in range(ks_):
            h = h + yp[:, t:t + S, :] @ p["cw1"][t]
        h = jnp.maximum(h, 0.0)
        z = h @ p["cw2"] + p["cb2"]
        z = ln(z + y, p["ln2_g"], p["ln2_b"])
        x = jnp.where(qm, 0.0, z)
    return x


if __name__ == "__main__":
    # Small, module-consistent hyperparameters.
    n_vocab = 20            # n_src_vocab
    len_max_seq = 16        # -> n_position = 17
    d_model = 32            # encoder_hidden / d_word_vec
    d_inner = 64            # fft_conv1d_filter_size
    n_layers = 2
    n_head = 2
    d_k = d_v = d_model // n_head
    B, S = 2, 8

    key = jax.random.PRNGKey(0)
    pkey, skey = jax.random.split(key)
    params = init_params(pkey, n_vocab=n_vocab, n_pos=len_max_seq + 1,
                         d_model=d_model, d_inner=d_inner, n_layers=n_layers,
                         n_head=n_head, d_k=d_k, d_v=d_v)

    src_seq = jax.random.randint(skey, (B, S), 1, n_vocab, dtype=jnp.int32)
    src_seq = src_seq.at[1, 5:].set(0)     # pad the tail of sequence 1
    mask = (src_seq == 0)                  # True where padding (Constants.PAD = 0)

    out = encoder_forward(src_seq, mask, params, n_head=n_head, d_k=d_k, d_v=d_v)
    out = jax.block_until_ready(out)

    ref = ref_encoder(src_seq, mask, params, n_head=n_head, d_k=d_k, d_v=d_v)
    assert out.shape == (B, S, d_model)
    # bf16 matmul operands => slightly looser tolerance than pure f32.
    np.testing.assert_allclose(np.asarray(out), np.asarray(ref), rtol=3e-2, atol=3e-2)
    print("KERNEL_OK")
</pallas_src>

<mosaic_0001>
module attributes {stable_mosaic.version = 11 : i64} {
  func.func @encoder_stack_kernel(%arg0: i32, %arg1: i32, %arg2: memref<16x128xf32, #tpu.memory_space<vmem>>, %arg3: memref<2x1x8xf32, #tpu.memory_space<vmem>>, %arg4: memref<16x1xf32, #tpu.memory_space<vmem>>, %arg5: memref<1x128x768xbf16, #tpu.memory_space<vmem>>, %arg6: memref<1x256x128xbf16, #tpu.memory_space<vmem>>, %arg7: memref<1x1152x128xbf16, #tpu.memory_space<vmem>>, %arg8: memref<1x128x128xbf16, #tpu.memory_space<vmem>>, %arg9: memref<1x8x768xf32, #tpu.memory_space<vmem>>, %arg10: memref<16x128xf32, #tpu.memory_space<vmem>>, %arg11: memref<2x16x128xf32, #tpu.memory_space<vmem>>) attributes {dimension_semantics = [#tpu.dimension_semantics<parallel>, #tpu.dimension_semantics<arbitrary>], iteration_bounds = array<i64: 1, 2>, scalar_prefetch = 0 : i64, scratch_operands = 1 : i64, tpu.core_type = #tpu.core_type<tc>, window_params = [{transform_indices = @transform_0, window_bounds = array<i64: 16, 128>}, {transform_indices = @transform_1, window_bounds = array<i64: 2, 1, 8>}, {transform_indices = @transform_2, window_bounds = array<i64: 16, 1>}, {transform_indices = @transform_3, window_bounds = array<i64: 1, 128, 768>}, {transform_indices = @transform_4, window_bounds = array<i64: 1, 256, 128>}, {transform_indices = @transform_5, window_bounds = array<i64: 1, 1152, 128>}, {transform_indices = @transform_6, window_bounds = array<i64: 1, 128, 128>}, {transform_indices = @transform_7, window_bounds = array<i64: 1, 8, 768>}, {transform_indices = @transform_8, window_bounds = array<i64: 16, 128>}]} {
    %c0_i32 = arith.constant 0 : i32
    %0 = arith.cmpi eq, %arg1, %c0_i32 : i32
    %1 = arith.extui %0 : i1 to i32
    %c0_i32_0 = arith.constant 0 : i32
    %2 = arith.cmpi ne, %1, %c0_i32_0 : i32
    scf.if %2 {
      %c0_91 = arith.constant 0 : index
      %c0_92 = arith.constant 0 : index
      %167 = vector.load %arg2[%c0_91, %c0_92] : memref<16x128xf32, #tpu.memory_space<vmem>>, vector<16x128xf32>
      %c0_93 = arith.constant 0 : index
      %c0_94 = arith.constant 0 : index
      %168 = vector.load %arg10[%c0_93, %c0_94] : memref<16x128xf32, #tpu.memory_space<vmem>>, vector<16x128xf32>
      tpu.vector_store %arg10[%c0_93, %c0_94], %167 {strides = array<i32>} : memref<16x128xf32, #tpu.memory_space<vmem>>, vector<16x128xf32>,
      %cst_95 = arith.constant 0.000000e+00 : f32
      %169 = vector.broadcast %cst_95 : f32 to vector<2x16x128xf32>
      %c0_96 = arith.constant 0 : index
      %c0_97 = arith.constant 0 : index
      %c0_98 = arith.constant 0 : index
      %170 = vector.load %arg11[%c0_96, %c0_97, %c0_98] : memref<2x16x128xf32, #tpu.memory_space<vmem>>, vector<2x16x128xf32>
      tpu.vector_store %arg11[%c0_96, %c0_97, %c0_98], %169 {strides = array<i32>} : memref<2x16x128xf32, #tpu.memory_space<vmem>>, vector<2x16x128xf32>,
    } else {
    }
    %c0 = arith.constant 0 : index
    %c0_1 = arith.constant 0 : index
    %3 = vector.load %arg10[%c0, %c0_1] : memref<16x128xf32, #tpu.memory_space<vmem>>, vector<16x128xf32>
    %c0_2 = arith.constant 0 : index
    %c0_3 = arith.constant 0 : index
    %c0_4 = arith.constant 0 : index
    %4 = vector.load %arg3[%c0_2, %c0_3, %c0_4] : memref<2x1x8xf32, #tpu.memory_space<vmem>>, vector<2x1x8xf32>
    %c0_5 = arith.constant 0 : index
    %c0_6 = arith.constant 0 : index
    %5 = vector.load %arg4[%c0_5, %c0_6] : memref<16x1xf32, #tpu.memory_space<vmem>>, vector<16x1xf32>
    %c0_7 = arith.constant 0 : index
    %c0_8 = arith.constant 0 : index
    %c0_9 = arith.constant 0 : index
    %6 = vector.load %arg9[%c0_7, %c0_8, %c0_9] : memref<1x8x768xf32, #tpu.memory_space<vmem>>, vector<1x1x768xf32>
    %7 = vector.shape_cast %6 : vector<1x1x768xf32> to vector<1x768xf32>
    %c0_10 = arith.constant 0 : index
    %c1 = arith.constant 1 : index
    %c0_11 = arith.constant 0 : index
    %8 = vector.load %arg9[%c0_10, %c1, %c0_11] : memref<1x8x768xf32, #tpu.memory_space<vmem>>, vector<1x1x128xf32>
    %9 = vector.shape_cast %8 : vector<1x1x128xf32> to vector<1x128xf32>
    %c0_12 = arith.constant 0 : index
    %c2 = arith.constant 2 : index
    %c0_13 = arith.constant 0 : index
    %10 = vector.load %arg9[%c0_12, %c2, %c0_13] : memref<1x8x768xf32, #tpu.memory_space<vmem>>, vector<1x1x128xf32>
    %11 = vector.shape_cast %10 : vector<1x1x128xf32> to vector<1x128xf32>
    %c0_14 = arith.constant 0 : index
    %c3 = arith.constant 3 : index
    %c0_15 = arith.constant 0 : index
    %12 = vector.load %arg9[%c0_14, %c3, %c0_15] : memref<1x8x768xf32, #tpu.memory_space<vmem>>, vector<1x1x128xf32>
    %13 = vector.shape_cast %12 : vector<1x1x128xf32> to vector<1x128xf32>
    %c0_16 = arith.constant 0 : index
    %c4 = arith.constant 4 : index
    %c0_17 = arith.constant 0 : index
    %14 = vector.load %arg9[%c0_16, %c4, %c0_17] : memref<1x8x768xf32, #tpu.memory_space<vmem>>, vector<1x1x128xf32>
    %15 = vector.shape_cast %14 : vector<1x1x128xf32> to vector<1x128xf32>
    %c0_18 = arith.constant 0 : index
    %c5 = arith.constant 5 : index
    %c0_19 = arith.constant 0 : index
    %16 = vector.load %arg9[%c0_18, %c5, %c0_19] : memref<1x8x768xf32, #tpu.memory_space<vmem>>, vector<1x1x128xf32>
    %17 = vector.shape_cast %16 : vector<1x1x128xf32> to vector<1x128xf32>
    %c0_20 = arith.constant 0 : index
    %c6 = arith.constant 6 : index
    %c0_21 = arith.constant 0 : index
    %18 = vector.load %arg9[%c0_20, %c6, %c0_21] : memref<1x8x768xf32, #tpu.memory_space<vmem>>, vector<1x1x128xf32>
    %19 = vector.shape_cast %18 : vector<1x1x128xf32> to vector<1x128xf32>
    %c0_22 = arith.constant 0 : index
    %c7 = arith.constant 7 : index
    %c0_23 = arith.constant 0 : index
    %20 = vector.load %arg9[%c0_22, %c7, %c0_23] : memref<1x8x768xf32, #tpu.memory_space<vmem>>, vector<1x1x128xf32>
    %21 = vector.shape_cast %20 : vector<1x1x128xf32> to vector<1x128xf32>
    %22 = arith.truncf %3 : vector<16x128xf32> to vector<16x128xbf16>
    %c0_24 = arith.constant 0 : index
    %c0_25 = arith.constant 0 : index
    %c0_26 = arith.constant 0 : index
    %23 = vector.load %arg5[%c0_24, %c0_25, %c0_26] : memref<1x128x768xbf16, #tpu.memory_space<vmem>>, vector<1x128x768xbf16>
    %24 = vector.shape_cast %23 : vector<1x128x768xbf16> to vector<128x768xbf16>
    %cst = arith.constant dense<0.000000e+00> : vector<16x768xf32>
    %25 = tpu.matmul %22, %24, %cst {dimension_numbers = #tpu.dot_dimension_numbers<[1], [0], [0], [1], [0, 0, 1, 1], [], []>} : vector<16x128xbf16>, vector<128x768xbf16>, vector<16x768xf32> -> vector<16x768xf32>
    %26 = vector.broadcast %7 : vector<1x768xf32> to vector<16x768xf32>
    %27 = arith.addf %25, %26 : vector<16x768xf32>
    %28 = vector.extract_strided_slice %27 {offsets = [0, 0], sizes = [16, 128], strides = [1, 1]} : vector<16x768xf32> to vector<16x128xf32>
    %29 = vector.shape_cast %28 : vector<16x128xf32> to vector<2x8x128xf32>
    %30 = arith.truncf %29 : vector<2x8x128xf32> to vector<2x8x128xbf16>
    %31 = vector.extract_strided_slice %27 {offsets = [0, 256], sizes = [16, 128], strides = [1, 1]} : vector<16x768xf32> to vector<16x128xf32>
    %32 = vector.shape_cast %31 : vector<16x128xf32> to vector<2x8x128xf32>
    %33 = arith.truncf %32 : vector<2x8x128xf32> to vector<2x8x128xbf16>
    %34 = vector.extract_strided_slice %27 {offsets = [0, 512], sizes = [16, 128], strides = [1, 1]} : vector<16x768xf32> to vector<16x128xf32>
    %35 = vector.shape_cast %34 : vector<16x128xf32> to vector<2x8x128xf32>
    %36 = arith.truncf %35 : vector<2x8x128xf32> to vector<2x8x128xbf16>
    %cst_27 = arith.constant dense<0.000000e+00> : vector<2x8x8xf32>
    %37 = tpu.matmul %30, %33, %cst_27 {dimension_numbers = #tpu.dot_dimension_numbers<[2], [2], [1], [1], [0, 0, 0, 1, 1, 1], [0], [0]>} : vector<2x8x128xbf16>, vector<2x8x128xbf16>, vector<2x8x8xf32> -> vector<2x8x8xf32>
    %38 = vector.broadcast %4 : vector<2x1x8xf32> to vector<2x8x8xf32>
    %39 = arith.addf %37, %38 : vector<2x8x8xf32>
    %cst_28 = arith.constant dense<0xFF800000> : vector<2x8xf32>
    %40 = vector.multi_reduction <maximumf>, %39, %cst_28 [2] : vector<2x8x8xf32> to vector<2x8xf32>
    %41 = vector.shape_cast %40 : vector<2x8xf32> to vector<2x8x1xf32>
    %42 = vector.broadcast %41 : vector<2x8x1xf32> to vector<2x8x8xf32>
    %43 = arith.subf %39, %42 : vector<2x8x8xf32>
    %44 = math.exp %43 : vector<2x8x8xf32>
    %cst_29 = arith.constant dense<0.000000e+00> : vector<2x8xf32>
    %45 = vector.multi_reduction <add>, %44, %cst_29 [2] : vector<2x8x8xf32> to vector<2x8xf32>
    %46 = vector.shape_cast %45 : vector<2x8xf32> to vector<2x8x1xf32>
    %47 = tpu.reciprocal %46 : vector<2x8x1xf32> -> vector<2x8x1xf32>
    %48 = vector.broadcast %47 : vector<2x8x1xf32> to vector<2x8x8xf32>
    %49 = arith.mulf %44, %48 : vector<2x8x8xf32>
    %50 = arith.truncf %49 : vector<2x8x8xf32> to vector<2x8x8xbf16>
    %cst_30 = arith.constant dense<0.000000e+00> : vector<2x8x128xf32>
    %51 = tpu.matmul %50, %36, %cst_30 {dimension_numbers = #tpu.dot_dimension_numbers<[2], [1], [1], [2], [0, 0, 0, 1, 1, 2], [0], [0]>} : vector<2x8x8xbf16>, vector<2x8x128xbf16>, vector<2x8x128xf32> -> vector<2x8x128xf32>
    %52 = vector.shape_cast %51 : vector<2x8x128xf32> to vector<16x128xf32>
    %53 = vector.extract_strided_slice %27 {offsets = [0, 128], sizes = [16, 128], strides = [1, 1]} : vector<16x768xf32> to vector<16x128xf32>
    %54 = vector.shape_cast %53 : vector<16x128xf32> to vector<2x8x128xf32>
    %55 = arith.truncf %54 : vector<2x8x128xf32> to vector<2x8x128xbf16>
    %56 = vector.extract_strided_slice %27 {offsets = [0, 384], sizes = [16, 128], strides = [1, 1]} : vector<16x768xf32> to vector<16x128xf32>
    %57 = vector.shape_cast %56 : vector<16x128xf32> to vector<2x8x128xf32>
    %58 = arith.truncf %57 : vector<2x8x128xf32> to vector<2x8x128xbf16>
    %59 = vector.extract_strided_slice %27 {offsets = [0, 640], sizes = [16, 128], strides = [1, 1]} : vector<16x768xf32> to vector<16x128xf32>
    %60 = vector.shape_cast %59 : vector<16x128xf32> to vector<2x8x128xf32>
    %61 = arith.truncf %60 : vector<2x8x128xf32> to vector<2x8x128xbf16>
    %cst_31 = arith.constant dense<0.000000e+00> : vector<2x8x8xf32>
    %62 = tpu.matmul %55, %58, %cst_31 {dimension_numbers = #tpu.dot_dimension_numbers<[2], [2], [1], [1], [0, 0, 0, 1, 1, 1], [0], [0]>} : vector<2x8x128xbf16>, vector<2x8x128xbf16>, vector<2x8x8xf32> -> vector<2x8x8xf32>
    %63 = vector.broadcast %4 : vector<2x1x8xf32> to vector<2x8x8xf32>
    %64 = arith.addf %62, %63 : vector<2x8x8xf32>
    %cst_32 = arith.constant dense<0xFF800000> : vector<2x8xf32>
    %65 = vector.multi_reduction <maximumf>, %64, %cst_32 [2] : vector<2x8x8xf32> to vector<2x8xf32>
    %66 = vector.shape_cast %65 : vector<2x8xf32> to vector<2x8x1xf32>
    %67 = vector.broadcast %66 : vector<2x8x1xf32> to vector<2x8x8xf32>
    %68 = arith.subf %64, %67 : vector<2x8x8xf32>
    %69 = math.exp %68 : vector<2x8x8xf32>
    %cst_33 = arith.constant dense<0.000000e+00> : vector<2x8xf32>
    %70 = vector.multi_reduction <add>, %69, %cst_33 [2] : vector<2x8x8xf32> to vector<2x8xf32>
    %71 = vector.shape_cast %70 : vector<2x8xf32> to vector<2x8x1xf32>
    %72 = tpu.reciprocal %71 : vector<2x8x1xf32> -> vector<2x8x1xf32>
    %73 = vector.broadcast %72 : vector<2x8x1xf32> to vector<2x8x8xf32>
    %74 = arith.mulf %69, %73 : vector<2x8x8xf32>
    %75 = arith.truncf %74 : vector<2x8x8xf32> to vector<2x8x8xbf16>
    %cst_34 = arith.constant dense<0.000000e+00> : vector<2x8x128xf32>
    %76 = tpu.matmul %75, %61, %cst_34 {dimension_numbers = #tpu.dot_dimension_numbers<[2], [1], [1], [2], [0, 0, 0, 1, 1, 2], [0], [0]>} : vector<2x8x8xbf16>, vector<2x8x128xbf16>, vector<2x8x128xf32> -> vector<2x8x128xf32>
    %77 = vector.shape_cast %76 : vector<2x8x128xf32> to vector<16x128xf32>
    %78 = tpu.concatenate %52, %77 in 1 : vector<16x128xf32>, vector<16x128xf32> -> vector<16x256xf32>
    %79 = arith.truncf %78 : vector<16x256xf32> to vector<16x256xbf16>
    %c0_35 = arith.constant 0 : index
    %c0_36 = arith.constant 0 : index
    %c0_37 = arith.constant 0 : index
    %80 = vector.load %arg6[%c0_35, %c0_36, %c0_37] : memref<1x256x128xbf16, #tpu.memory_space<vmem>>, vector<1x256x128xbf16>
    %81 = vector.shape_cast %80 : vector<1x256x128xbf16> to vector<256x128xbf16>
    %cst_38 = arith.constant dense<0.000000e+00> : vector<16x128xf32>
    %82 = tpu.matmul %79, %81, %cst_38 {dimension_numbers = #tpu.dot_dimension_numbers<[1], [0], [0], [1], [0, 0, 1, 1], [], []>} : vector<16x256xbf16>, vector<256x128xbf16>, vector<16x128xf32> -> vector<16x128xf32>
    %83 = vector.broadcast %9 : vector<1x128xf32> to vector<16x128xf32>
    %84 = arith.addf %82, %83 : vector<16x128xf32>
    %85 = arith.addf %84, %3 : vector<16x128xf32>
    %cst_39 = arith.constant dense<0.000000e+00> : vector<16xf32>
    %86 = vector.multi_reduction <add>, %85, %cst_39 [1] : vector<16x128xf32> to vector<16xf32>
    %87 = vector.shape_cast %86 : vector<16xf32> to vector<16x1xf32>
    %cst_40 = arith.constant 3.125000e-02 : f32
    %88 = vector.broadcast %cst_40 : f32 to vector<16x1xf32>
    %89 = arith.mulf %87, %88 : vector<16x1xf32>
    %90 = arith.mulf %85, %85 : vector<16x128xf32>
    %cst_41 = arith.constant dense<0.000000e+00> : vector<16xf32>
    %91 = vector.multi_reduction <add>, %90, %cst_41 [1] : vector<16x128xf32> to vector<16xf32>
    %92 = vector.shape_cast %91 : vector<16xf32> to vector<16x1xf32>
    %cst_42 = arith.constant 3.125000e-02 : f32
    %93 = vector.broadcast %cst_42 : f32 to vector<16x1xf32>
    %94 = arith.mulf %92, %93 : vector<16x1xf32>
    %95 = arith.mulf %89, %89 : vector<16x1xf32>
    %96 = arith.subf %94, %95 : vector<16x1xf32>
    %cst_43 = arith.constant 0.000000e+00 : f32
    %97 = vector.broadcast %cst_43 : f32 to vector<16x1xf32>
    %98 = arith.maximumf %96, %97 : vector<16x1xf32>
    %99 = vector.broadcast %89 : vector<16x1xf32> to vector<16x128xf32>
    %100 = arith.subf %85, %99 : vector<16x128xf32>
    %cst_44 = arith.constant 9.99999974E-6 : f32
    %101 = vector.broadcast %cst_44 : f32 to vector<16x1xf32>
    %102 = arith.addf %98, %101 : vector<16x1xf32>
    %103 = math.rsqrt %102 : vector<16x1xf32>
    %104 = vector.broadcast %103 : vector<16x1xf32> to vector<16x128xf32>
    %105 = arith.mulf %100, %104 : vector<16x128xf32>
    %106 = vector.broadcast %11 : vector<1x128xf32> to vector<16x128xf32>
    %107 = arith.mulf %105, %106 : vector<16x128xf32>
    %108 = vector.broadcast %13 : vector<1x128xf32> to vector<16x128xf32>
    %109 = arith.addf %107, %108 : vector<16x128xf32>
    %110 = vector.broadcast %5 : vector<16x1xf32> to vector<16x128xf32>
    %111 = arith.mulf %109, %110 : vector<16x128xf32>
    %112 = vector.shape_cast %111 : vector<16x128xf32> to vector<2x8x128xf32>
    %c0_45 = arith.constant 0 : index
    %c4_46 = arith.constant 4 : index
    %c0_47 = arith.constant 0 : index
    %113 = vector.load %arg11[%c0_45, %c4_46, %c0_47] : memref<2x16x128xf32, #tpu.memory_space<vmem>>, vector<2x8x128xf32>
    tpu.vector_store %arg11[%c0_45, %c4_46, %c0_47], %112 {strides = array<i32>} : memref<2x16x128xf32, #tpu.memory_space<vmem>>, vector<2x8x128xf32>,
    %c0_48 = arith.constant 0 : index
    %c0_49 = arith.constant 0 : index
    %c0_50 = arith.constant 0 : index
    %114 = vector.load %arg11[%c0_48, %c0_49, %c0_50] : memref<2x16x128xf32, #tpu.memory_space<vmem>>, vector<2x8x128xf32>
    %c0_51 = arith.constant 0 : index
    %c1_52 = arith.constant 1 : index
    %c0_53 = arith.constant 0 : index
    %115 = vector.load %arg11[%c0_51, %c1_52, %c0_53] : memref<2x16x128xf32, #tpu.memory_space<vmem>>, vector<2x8x128xf32>
    %c0_54 = arith.constant 0 : index
    %c2_55 = arith.constant 2 : index
    %c0_56 = arith.constant 0 : index
    %116 = vector.load %arg11[%c0_54, %c2_55, %c0_56] : memref<2x16x128xf32, #tpu.memory_space<vmem>>, vector<2x8x128xf32>
    %c0_57 = arith.constant 0 : index
    %c3_58 = arith.constant 3 : index
    %c0_59 = arith.constant 0 : index
    %117 = vector.load %arg11[%c0_57, %c3_58, %c0_59] : memref<2x16x128xf32, #tpu.memory_space<vmem>>, vector<2x8x128xf32>
    %c0_60 = arith.constant 0 : index
    %c4_61 = arith.constant 4 : index
    %c0_62 = arith.constant 0 : index
    %118 = vector.load %arg11[%c0_60, %c4_61, %c0_62] : memref<2x16x128xf32, #tpu.memory_space<vmem>>, vector<2x8x128xf32>
    %c0_63 = arith.constant 0 : index
    %c5_64 = arith.constant 5 : index
    %c0_65 = arith.constant 0 : index
    %119 = vector.load %arg11[%c0_63, %c5_64, %c0_65] : memref<2x16x128xf32, #tpu.memory_space<vmem>>, vector<2x8x128xf32>
    %c0_66 = arith.constant 0 : index
    %c6_67 = arith.constant 6 : index
    %c0_68 = arith.constant 0 : index
    %120 = vector.load %arg11[%c0_66, %c6_67, %c0_68] : memref<2x16x128xf32, #tpu.memory_space<vmem>>, vector<2x8x128xf32>
    %c0_69 = arith.constant 0 : index
    %c7_70 = arith.constant 7 : index
    %c0_71 = arith.constant 0 : index
    %121 = vector.load %arg11[%c0_69, %c7_70, %c0_71] : memref<2x16x128xf32, #tpu.memory_space<vmem>>, vector<2x8x128xf32>
    %c0_72 = arith.constant 0 : index
    %c8 = arith.constant 8 : index
    %c0_73 = arith.constant 0 : index
    %122 = vector.load %arg11[%c0_72, %c8, %c0_73] : memref<2x16x128xf32, #tpu.memory_space<vmem>>, vector<2x8x128xf32>
    %123 = tpu.concatenate %114, %115, %116, %117, %118, %119, %120, %121, %122 in 2 : vector<2x8x128xf32>, vector<2x8x128xf32>, vector<2x8x128xf32>, vector<2x8x128xf32>, vector<2x8x128xf32>, vector<2x8x128xf32>, vector<2x8x128xf32>, vector<2x8x128xf32>, vector<2x8x128xf32> -> vector<2x8x1152xf32>
    %124 = vector.shape_cast %123 : vector<2x8x1152xf32> to vector<16x1152xf32>
    %125 = arith.truncf %124 : vector<16x1152xf32> to vector<16x1152xbf16>
    %c0_74 = arith.constant 0 : index
    %c0_75 = arith.constant 0 : index
    %c0_76 = arith.constant 0 : index
    %126 = vector.load %arg7[%c0_74, %c0_75, %c0_76] : memref<1x1152x128xbf16, #tpu.memory_space<vmem>>, vector<1x1152x128xbf16>
    %127 = vector.shape_cast %126 : vector<1x1152x128xbf16> to vector<1152x128xbf16>
    %cst_77 = arith.constant dense<0.000000e+00> : vector<16x128xf32>
    %128 = tpu.matmul %125, %127, %cst_77 {dimension_numbers = #tpu.dot_dimension_numbers<[1], [0], [0], [1], [0, 0, 1, 1], [], []>} : vector<16x1152xbf16>, vector<1152x128xbf16>, vector<16x128xf32> -> vector<16x128xf32>
    %129 = vector.broadcast %15 : vector<1x128xf32> to vector<16x128xf32>
    %130 = arith.addf %128, %129 : vector<16x128xf32>
    %cst_78 = arith.constant 0.000000e+00 : f32
    %131 = vector.broadcast %cst_78 : f32 to vector<16x128xf32>
    %132 = arith.maximumf %130, %131 : vector<16x128xf32>
    %133 = arith.truncf %132 : vector<16x128xf32> to vector<16x128xbf16>
    %c0_79 = arith.constant 0 : index
    %c0_80 = arith.constant 0 : index
    %c0_81 = arith.constant 0 : index
    %134 = vector.load %arg8[%c0_79, %c0_80, %c0_81] : memref<1x128x128xbf16, #tpu.memory_space<vmem>>, vector<1x128x128xbf16>
    %135 = vector.shape_cast %134 : vector<1x128x128xbf16> to vector<128x128xbf16>
    %cst_82 = arith.constant dense<0.000000e+00> : vector<16x128xf32>
    %136 = tpu.matmul %133, %135, %cst_82 {dimension_numbers = #tpu.dot_dimension_numbers<[1], [0], [0], [1], [0, 0, 1, 1], [], []>} : vector<16x128xbf16>, vector<128x128xbf16>, vector<16x128xf32> -> vector<16x128xf32>
    %137 = vector.broadcast %17 : vector<1x128xf32> to vector<16x128xf32>
    %138 = arith.addf %136, %137 : vector<16x128xf32>
    %139 = arith.addf %138, %111 : vector<16x128xf32>
    %cst_83 = arith.constant dense<0.000000e+00> : vector<16xf32>
    %140 = vector.multi_reduction <add>, %139, %cst_83 [1] : vector<16x128xf32> to vector<16xf32>
    %141 = vector.shape_cast %140 : vector<16xf32> to vector<16x1xf32>
    %cst_84 = arith.constant 3.125000e-02 : f32
    %142 = vector.broadcast %cst_84 : f32 to vector<16x1xf32>
    %143 = arith.mulf %141, %142 : vector<16x1xf32>
    %144 = arith.mulf %139, %139 : vector<16x128xf32>
    %cst_85 = arith.constant dense<0.000000e+00> : vector<16xf32>
    %145 = vector.multi_reduction <add>, %144, %cst_85 [1] : vector<16x128xf32> to vector<16xf32>
    %146 = vector.shape_cast %145 : vector<16xf32> to vector<16x1xf32>
    %cst_86 = arith.constant 3.125000e-02 : f32
    %147 = vector.broadcast %cst_86 : f32 to vector<16x1xf32>
    %148 = arith.mulf %146, %147 : vector<16x1xf32>
    %149 = arith.mulf %143, %143 : vector<16x1xf32>
    %150 = arith.subf %148, %149 : vector<16x1xf32>
    %cst_87 = arith.constant 0.000000e+00 : f32
    %151 = vector.broadcast %cst_87 : f32 to vector<16x1xf32>
    %152 = arith.maximumf %150, %151 : vector<16x1xf32>
    %153 = vector.broadcast %143 : vector<16x1xf32> to vector<16x128xf32>
    %154 = arith.subf %139, %153 : vector<16x128xf32>
    %cst_88 = arith.constant 9.99999974E-6 : f32
    %155 = vector.broadcast %cst_88 : f32 to vector<16x1xf32>
    %156 = arith.addf %152, %155 : vector<16x1xf32>
    %157 = math.rsqrt %156 : vector<16x1xf32>
    %158 = vector.broadcast %157 : vector<16x1xf32> to vector<16x128xf32>
    %159 = arith.mulf %154, %158 : vector<16x128xf32>
    %160 = vector.broadcast %19 : vector<1x128xf32> to vector<16x128xf32>
    %161 = arith.mulf %159, %160 : vector<16x128xf32>
    %162 = vector.broadcast %21 : vector<1x128xf32> to vector<16x128xf32>
    %163 = arith.addf %161, %162 : vector<16x128xf32>
    %164 = vector.broadcast %5 : vector<16x1xf32> to vector<16x128xf32>
    %165 = arith.mulf %163, %164 : vector<16x128xf32>
    %c0_89 = arith.constant 0 : index
    %c0_90 = arith.constant 0 : index
    %166 = vector.load %arg10[%c0_89, %c0_90] : memref<16x128xf32, #tpu.memory_space<vmem>>, vector<16x128xf32>
    tpu.vector_store %arg10[%c0_89, %c0_90], %165 {strides = array<i32>} : memref<16x128xf32, #tpu.memory_space<vmem>>, vector<16x128xf32>,
    return
  }
  func.func @transform_0(%arg0: i32, %arg1: i32) -> (i32, i32) {
    %c0_i32 = arith.constant 0 : i32
    %c0_i32_0 = arith.constant 0 : i32
    return %arg0, %c0_i32 : i32, i32
  }
  func.func @transform_1(%arg0: i32, %arg1: i32) -> (i32, i32, i32) {
    %c0_i32 = arith.constant 0 : i32
    %c0_i32_0 = arith.constant 0 : i32
    %c0_i32_1 = arith.constant 0 : i32
    return %arg0, %c0_i32, %c0_i32_0 : i32, i32, i32
  }
  func.func @transform_2(%arg0: i32, %arg1: i32) -> (i32, i32) {
    %c0_i32 = arith.constant 0 : i32
    %c0_i32_0 = arith.constant 0 : i32
    return %arg0, %c0_i32 : i32, i32
  }
  func.func @transform_3(%arg0: i32, %arg1: i32) -> (i32, i32, i32) {
    %c0_i32 = arith.constant 0 : i32
    %c0_i32_0 = arith.constant 0 : i32
    %c0_i32_1 = arith.constant 0 : i32
    return %arg1, %c0_i32, %c0_i32_0 : i32, i32, i32
  }
  func.func @transform_4(%arg0: i32, %arg1: i32) -> (i32, i32, i32) {
    %c0_i32 = arith.constant 0 : i32
    %c0_i32_0 = arith.constant 0 : i32
    %c0_i32_1 = arith.constant 0 : i32
    return %arg1, %c0_i32, %c0_i32_0 : i32, i32, i32
  }
  func.func @transform_5(%arg0: i32, %arg1: i32) -> (i32, i32, i32) {
    %c0_i32 = arith.constant 0 : i32
    %c0_i32_0 = arith.constant 0 : i32
    %c0_i32_1 = arith.constant 0 : i32
    return %arg1, %c0_i32, %c0_i32_0 : i32, i32, i32
  }
  func.func @transform_6(%arg0: i32, %arg1: i32) -> (i32, i32, i32) {
    %c0_i32 = arith.constant 0 : i32
    %c0_i32_0 = arith.constant 0 : i32
    %c0_i32_1 = arith.constant 0 : i32
    return %arg1, %c0_i32, %c0_i32_0 : i32, i32, i32
  }
  func.func @transform_7(%arg0: i32, %arg1: i32) -> (i32, i32, i32) {
    %c0_i32 = arith.constant 0 : i32
    %c0_i32_0 = arith.constant 0 : i32
    %c0_i32_1 = arith.constant 0 : i32
    return %arg1, %c0_i32, %c0_i32_0 : i32, i32, i32
  }
  func.func @transform_8(%arg0: i32, %arg1: i32) -> (i32, i32) {
    %c0_i32 = arith.constant 0 : i32
    %c0_i32_0 = arith.constant 0 : i32
    return %arg0, %c0_i32 : i32, i32
  }
}

</mosaic_0001>

<bundles_post_ra>
// kernel: tpu_custom_call.1
= control target key start
LH: loop header
LB: loop body
LE: loop exit
PB: predicated region body
PF: predicated region fallthrough
CT: control target
= control target key end

     0   :  { %s4329_s0 = inlined_call_operand.vmem [shape: f32[16,128], index: 0, kind: input, shape index: {}]   ;;  %s4330_s1 = inlined_call_operand.vmem [shape: f32[2,1,8], index: 1, kind: input, shape index: {}]   ;;  %s4331_s2 = inlined_call_operand.vmem [shape: f32[16,1], index: 2, kind: input, shape index: {}]   ;;  %s4332_s3 = inlined_call_operand.hbm [shape: bf16[2,128,768], index: 3, kind: input, shape index: {}]   ;;  %s4333_s4 = inlined_call_operand.hbm [shape: bf16[2,256,128], index: 4, kind: input, shape index: {}]   ;;  %s4334_s5 = inlined_call_operand.hbm [shape: bf16[2,1152,128], index: 5, kind: input, shape index: {}]   ;;  %s4335_s6 = inlined_call_operand.hbm [shape: bf16[2,128,128], index: 6, kind: input, shape index: {}]   ;;  %s4336_s7 = inlined_call_operand.hbm [shape: f32[2,8,768], index: 7, kind: input, shape index: {}]   ;;  %s4337_s8 = inlined_call_operand.hbm [shape: f32[16,128], index: 8, kind: output, shape index: {}]  }
   0x1   :  { %4348 = sst [smem:[#allocation22_spill]] %s4329_s0 }
   0x2   :  { %4349 = sst [smem:[#allocation23_spill]] %s4330_s1 }
   0x3   :  { %4350 = sst [smem:[#allocation24_spill]] %s4331_s2 }
   0x4   :  { %4351 = sst [smem:[#allocation25_spill]] %s4332_s3 }
   0x5   :  { %4352 = sst [smem:[#allocation26_spill]] %s4333_s4 }
   0x6   :  { %4353 = sst [smem:[#allocation27_spill]] %s4335_s6 }
   0x7   :  { %4354 = sst [smem:[#allocation28_spill]] %s4337_s8 }
   0x8   :  { %13 = vsyncpa [#allocation4], 0 }
   0x9   :  { %15 = vsyncpa [#allocation4 + $0x1], 0 }
   0xa   :  { %16 = vsyncpa [#allocation7], 0 }
   0xb   :  { %18 = vsyncpa [#allocation7 + $0x1], 0 }
   0xc   :  { %19 = vsyncpa [#allocation10], 0 }
   0xd   :  { %21 = vsyncpa [#allocation10 + $0x1], 0 }
   0xe   :  { %22 = vsyncpa [#allocation5], 0  ;;  %s3806_s27 = smov 0   ;;  %s3808_s28 = smov 0  }
   0xf   :  { %s3810_s29 = smov 0   ;;  %s3812_s30 = smov 0  }
  0x10   :  { %s3814_s9 = smov 0   ;;  %s3816_s10 = smov 0  }
  0x11 LB: > { %4355 = sst [smem:[#allocation17_spill]] %s3731_s29  ;;  %s3835_s11 = sadd.s32 4294967295, %s3743_s10   ;;  %s3743_s10 = sphi %s3816_s10, %s28_s10   ;;  %s3739_s9 = sphi %s3814_s9, %s4384_s9   ;;  %s3735_s30 = sphi %s3812_s30, %s4383_s30   ;;  %s3731_s29 = sphi %s3810_s29, %s4379_s29   ;;  %s3727_s28 = sphi %s3808_s28, %s4382_s28   ;;  %s3723_s27 = sphi %s3806_s27, %s4381_s27  }
  0x12   : > { %4356 = sst [smem:[#allocation18_spill]] %s3735_s30  ;;  %s37_s12 = sadd.s32 1, %s3739_s9 }
  0x13   : > { %4357 = sst [smem:[#allocation19_spill]] %s3743_s10  ;;  %p38_p0 = scmp.ge.s32.totalorder %s37_s12, 2 }
  0x14   : > { %s125_s13 = sadd.s32 1, %s3731_s29  ;;  %p132_p1 = scmp.ne.s32.totalorder %s3731_s29, %s3727_s28 }
  0x15   : > { %p133_p2 = scmp.eq.s32.totalorder %s3743_s10, 0  ;;  %s4386_s12 = smov (%p38_p0, %s37_s12), 0 }
  0x16   : > { %4358 = sst [smem:[#allocation20_spill]] %s4386_s12  ;;  %p138_p4 = scmp.ne.s32.totalorder %s3727_s28, %s3723_s27 }
  0x17   : > { %p134_p3 = por %p133_p2, %p132_p1  ;;  %s122_s14 = ssub.s32 %s3739_s9, %s4386_s12 }
  0x18   : > { %p139_p5 = scmp.eq.s32.totalorder %s3835_s11, 0  ;;  %p123_p6 = scmp.eq.s32.totalorder %s122_s14, 0 }
  0x19   : > { %p3261_p8 = scmp.lt.s32.totalorder %s3743_s10, 2  ;;  %s3857_s17 = sand.u32 1, %s3731_s29  }
  0x1a   : > { %p3848_p7 = por %p139_p5, %p138_p4  ;;  %s4338_s19 = sand.u32 1, %s3743_s10  }
  0x1b   : > { %s3854_s16 = scalar_select %p123_p6, %s3731_s29, %s125_s13  }
  0x1c   : > { %p3859_p9 = pnand %p3261_p8, %p134_p3  ;;  %s2822_s20 = sshll.u32 %s3857_s17, 7 }
  0x1d   : > { %4360 = sst [smem:[#allocation21_spill]] %s3854_s16  ;;  %s2988_s21 = sshll.u32 %s3739_s9, 11 }
  0x1e   : > { %s4362_s4 = sld [smem:[#allocation26_spill]]  ;;  %s343_s25 = scalar_lea.vmem [#allocation6], %s2822_s20 }
  0x1f   : > { %s350_s26 = sshll.u32 %s343_s25, 4  ;;  %p2830_p10 = scmp.ge.s32.totalorder %s3743_s10, 1  ;;  %s351_s26 = int_to_ptr.vmem [resolvable:$true] %s350_s26 }
  0x20   : > { %s3872_s27 = scalar_lea.sflag [#allocation7], %s4338_s19  ;;  %p3876_p11 = pneg %p3859_p9 }
  0x21   : > { %s3530_s14 = scalar_lea.vmem %s351_s26, 2048  ;;  %s3745_s22 = smov [#allocation6]  }
  0x22   : > { %p3531_p12 = scmp.ne.s32.totalorder %s351_s26, %s3530_s14 }
  0x24   : > { %s349_s24 = scalar_lea.hbm %s4362_s4, %s2988_s21  ;;  %p3533_p13 = pnand %p3531_p12, %p3876_p11 }
  0x25   : > { %s3535_s21 = sshll.u32 %s3745_s22, 4  ;;  %s3536_s21 = int_to_ptr.vmem [resolvable:$false] %s3535_s21 }
  0x26   : > { %p3534_p0 = pneg %p3533_p13  ;;  %s3537_s20 = scalar_lea.vmem %s3536_s21, 4096 }
  0x27   : > { %p3538_p1 = scmp.lt.s32.totalorder %s351_s26, %s3536_s21  ;;  %p3539_p2 = scmp.lt.s32.totalorder %s3537_s20, %s3530_s14 }
  0x29   : > { %p3540_p3 = por %p3539_p2, %p3538_p1 }
  0x2b   : > { %p3541_p4 = pnand %p3540_p3, %p3534_p0 }
  0x2d   : > { %3544 = shalt.err (!%p3541_p4)
}
  0x2e   : > { %s4342_s23 = smov 64   ;;  %s4346_s25 = smov 4  }
  0x2f   : > { %3251 = dma.hbm_to_vmem [thread:$0]  (!%p3859_p9), %s349_s24, 2048, %s351_s26, %s3872_s27, %s4342_s23, %s4342_s23, %s4346_s25  }
  0x30   : > { %p419_p5 = scmp.lt.s32.totalorder %s3743_s10, 3  ;;  %s2826_s14 = sshll.u32 %s3857_s17, 6 }
  0x31   : > { %s2989_s22 = sshll.u32 %s3739_s9, 10  ;;  %s4365_s6 = sld [smem:[#allocation27_spill]] }
  0x32   : > { %p3893_p6 = pnand %p2830_p10, %p419_p5  ;;  %s385_s12 = scalar_lea.vmem [#allocation9], %s2826_s14 }
  0x33   : > { %s392_s16 = sshll.u32 %s385_s12, 4  ;;  %s4366_s29 = sand.u32 1, %s3743_s10   ;;  %s393_s16 = int_to_ptr.vmem [resolvable:$true] %s392_s16 }
  0x34   : > { %s3902_s8 = scalar_lea.sflag [#allocation10], %s4366_s29  ;;  %s3558_s2 = scalar_lea.vmem %s393_s16, 1024 }
  0x35   : > { %p3559_p8 = scmp.ne.s32.totalorder %s393_s16, %s3558_s2  ;;  %s3748_s24 = smov [#allocation9]  }
  0x36   : > { %s3563_s26 = sshll.u32 %s3748_s24, 4  ;;  %s3564_s26 = int_to_ptr.vmem [resolvable:$false] %s3563_s26 }
  0x37   : > { %s391_s4 = scalar_lea.hbm %s4365_s6, %s2989_s22  ;;  %p3561_p12 = pnand %p3559_p8, %p3876_p11 }
  0x38   : > { %s3565_s23 = scalar_lea.vmem %s3564_s26, 2048  ;;  %p3566_p10 = scmp.lt.s32.totalorder %s393_s16, %s3564_s26 }
  0x39   : > { %p3562_p13 = pneg %p3561_p12  ;;  %p3567_p0 = scmp.lt.s32.totalorder %s3565_s23, %s3558_s2 }
  0x3b   : > { %p3568_p1 = por %p3567_p0, %p3566_p10 }
  0x3d   : > { %p3569_p2 = pnand %p3568_p1, %p3562_p13 }
  0x3f   : > { %3572 = shalt.err (!%p3569_p2)
}
  0x40   : > { %s4367_s12 = smov 64   ;;  %s3222_s29 = smul.u32 384, %s3857_s17 }
  0x41   : > { %3257 = dma.hbm_to_vmem [thread:$0]  (!%p3859_p9), %s391_s4, 1024, %s393_s16, %s3902_s8, %s4367_s12, %s4367_s12, %s4346_s25  }
  0x42   : > { %s3223_s19 = smul.u32 6144, %s3739_s9  ;;  %s4368_s3 = sld [smem:[#allocation25_spill]] }
  0x43   : > { %s3224_s14 = smul.u32 576, %s3857_s17  ;;  %s322_s20 = scalar_lea.vmem [#allocation3], %s3222_s29 }
  0x44   : > { %s329_s24 = sshll.u32 %s322_s20, 4  ;;  %s319_s26 = scalar_lea.sflag [#allocation4], %s3857_s17  ;;  %s330_s24 = int_to_ptr.vmem [resolvable:$true] %s329_s24 }
  0x45   : > { %s3586_s6 = scalar_lea.vmem %s330_s24, 6144  ;;  %s3749_s10 = smov [#allocation3]  }
  0x46   : > { %p3587_p3 = scmp.ne.s32.totalorder %s330_s24, %s3586_s6  ;;  %s3591_s1 = sshll.u32 %s3749_s10, 4  ;;  %s3592_s1 = int_to_ptr.vmem [resolvable:$false] %s3591_s1 }
  0x47   : > { %s3593_s4 = scalar_lea.vmem %s3592_s1, 12288  ;;  %p3594_p8 = scmp.lt.s32.totalorder %s330_s24, %s3592_s1 }
  0x48   : > { %s328_s23 = scalar_lea.hbm %s4368_s3, %s3223_s19  ;;  %p3589_p4 = pnand %p3587_p3, %p3876_p11 }
  0x49   : > { %p3595_p12 = scmp.lt.s32.totalorder %s3593_s4, %s3586_s6 }
  0x4a   : > { %p3590_p5 = pneg %p3589_p4 }
  0x4b   : > { %p3596_p13 = por %p3595_p12, %p3594_p8 }
  0x4d   : > { %p3597_p10 = pnand %p3596_p13, %p3590_p5 }
  0x4f   : > { %3600 = shalt.err (!%p3597_p10)
}
  0x50   : > { %s3750_s16 = smov 384   ;;  %s3751_s29 = smov 24  }
  0x51   : > { %3248 = dma.hbm_to_vmem [thread:$0]  (!%p3859_p9), %s328_s23, 6144, %s330_s24, %s319_s26, %s3750_s16, %s3750_s16, %s3751_s29  }
  0x52   : > { %s3225_s19 = smul.u32 9216, %s3739_s9  ;;  %s364_s22 = scalar_lea.vmem [#allocation8], %s3224_s14 }
  0x53   : > { %s371_s2 = sshll.u32 %s364_s22, 4  ;;  %s3226_s10 = smul.u32 48, %s3857_s17  ;;  %s372_s2 = int_to_ptr.vmem [resolvable:$true] %s371_s2 }
  0x54   : > { %s370_s6 = scalar_lea.hbm %s4334_s5, %s3225_s19  ;;  %s3227_s4 = smul.u32 768, %s3739_s9 }
  0x55   : > { %s3614_s25 = scalar_lea.vmem %s372_s2, 9216  ;;  %s3752_s3 = smov [#allocation8]  }
  0x56   : > { %p3615_p0 = scmp.ne.s32.totalorder %s372_s2, %s3614_s25  ;;  %s3619_s0 = sshll.u32 %s3752_s3, 4  ;;  %s3620_s0 = int_to_ptr.vmem [resolvable:$false] %s3619_s0 }
  0x57   : > { %s3621_s30 = scalar_lea.vmem %s3620_s0, 18432  ;;  %p3622_p3 = scmp.lt.s32.totalorder %s372_s2, %s3620_s0 }
  0x58   : > { %p3617_p1 = pnand %p3615_p0, %p3876_p11  ;;  %p3623_p4 = scmp.lt.s32.totalorder %s3621_s30, %s3614_s25 }
  0x5a   : > { %p3618_p2 = pneg %p3617_p1  ;;  %p3624_p5 = por %p3623_p4, %p3622_p3 }
  0x5c   : > { %p3625_p8 = pnand %p3624_p5, %p3618_p2 }
  0x5e   : > { %3628 = shalt.err (!%p3625_p8)
}
  0x5f   : > { %s4369_s17 = smov 4   ;;  %s412_s24 = scalar_lea.hbm %s4336_s7, %s3227_s4 }
  0x60   : > { %3254 = dma.hbm_to_vmem [thread:$0]  (!%p3859_p9), %s370_s6, 9216, %s372_s2, %s3872_s27, %s4367_s12, %s4367_s12, %s4369_s17  }
  0x61   : > { %s406_s3 = scalar_lea.vmem [#allocation11], %s3226_s10  ;;  %s3753_s30 = smov [#allocation11]  }
  0x62   : > { %s414_s26 = sshll.u32 %s406_s3, 4  ;;  %s3647_s25 = sshll.u32 %s3753_s30, 4  ;;  %s415_s26 = int_to_ptr.vmem [resolvable:$true] %s414_s26  ;;  %s3648_s25 = int_to_ptr.vmem [resolvable:$false] %s3647_s25 }
  0x63   : > { %s3642_s0 = scalar_lea.vmem %s415_s26, 768  ;;  %s3649_s16 = scalar_lea.vmem %s3648_s25, 1536 }
  0x64   : > { %p3643_p12 = scmp.ne.s32.totalorder %s415_s26, %s3642_s0  ;;  %p3650_p0 = scmp.lt.s32.totalorder %s415_s26, %s3648_s25 }
  0x65   : > { %p3651_p1 = scmp.lt.s32.totalorder %s3649_s16, %s3642_s0 }
  0x66   : > { %p3645_p13 = pnand %p3643_p12, %p3876_p11 }
  0x67   : > { %p3652_p2 = por %p3651_p1, %p3650_p0 }
  0x68   : > { %p3646_p10 = pneg %p3645_p13 }
  0x6a   : > { %p3653_p3 = pnand %p3652_p2, %p3646_p10 }
  0x6c   : > { %3656 = shalt.err (!%p3653_p3)
}
  0x6d   : > { %3260 = dma.hbm_to_vmem [thread:$0]  (!%p3859_p9), %s412_s24, 768, %s415_s26, %s3902_s8  }
  0x6e   : > { %423 = sbr.rel (%p3893_p6) target bundleno = 2657 (0xa61), region = 52  ;;  %s425_s27 = sand.u32 (!%p3893_p6), 1, %s3727_s28  }
  0x6f   : > { %s3228_s13 = smul.u32 (!%p3893_p6), 384, %s425_s27  ;;  %s426_s12 = scalar_lea.sflag (!%p3893_p6), [#allocation4], %s425_s27 }
  0x71   : > { %s3948_s29 = scalar_lea.vmem (!%p3893_p6), [#allocation3], %s3228_s13 }
  0x73   : > { %3706 = dma.done.wait (%p3848_p7), %s426_s12, 6144  }
  0x74   : > { %3708 = vsyncadd (%p3848_p7), %s426_s12, 4294961152  ;;  %s434_s18 = sand.u32 1, %s3835_s11   ;;  %s2831_s19 = sshll.u32 %s425_s27, 7 }
  0x75   : > { %s435_s8 = scalar_lea.sflag [#allocation7], %s434_s18  ;;  %s3955_s22 = scalar_lea.vmem [#allocation6], %s2831_s19 }
  0x76   : > { %3710 = dma.done.wait (%p3848_p7), %s435_s8, 11264  }
  0x77   : > { %3712 = vsyncadd (%p3848_p7), %s435_s8, 4294956032  ;;  %s3229_s21 = smul.u32 576, %s425_s27  ;;  %s2832_s2 = sshll.u32 %s425_s27, 6 }
  0x78   : > { %s453_s20 = scalar_lea.sflag [#allocation10], %s434_s18  ;;  %s3963_s1 = scalar_lea.vmem [#allocation9], %s2832_s2 }
  0x79   : > { %s3961_s10 = scalar_lea.vmem [#allocation8], %s3229_s21 }
  0x7a   : > { %3714 = dma.done.wait (%p3848_p7), %s453_s20, 1792  }
  0x7b   : > { %3716 = vsyncadd (%p3848_p7), %s453_s20, 4294965504  ;;  %s3230_s6 = smul.u32 48, %s425_s27  ;;  %s4370_s17 = sld [smem:[#allocation18_spill]] }
  0x7d   : > { %s3969_s4 = scalar_lea.vmem [#allocation11], %s3230_s6 }
  0x81   : > { %p2833_p9 = scmp.ne.s32.totalorder %s4370_s17, 0 }
  0x82   : > { %s4371_s24 = sld [smem:[#allocation22_spill]] (!%p2833_p9) }
  0x83   : > { %549 = sbr.rel (%p2833_p9) target bundleno = 140 (0x8c), region = 76 }
  0x88   : > { %v550_v0 = vld [vmem:[%s4371_s24] sm:$0xff]  ;;  %v551_v1 = vld [vmem:[%s4371_s24 + $0x8] sm:$0xff]  ;;  %v3754_v2 = vmov 0.0  }
  0x89   : > { %552 = vst [vmem:[#allocation12] sm:$0xff] %v550_v0  ;;  %553 = vst [vmem:[#allocation12 + $0x8] sm:$0xff] %v551_v1 }
  0x8a   : > { %554 = vst [vmem:[#allocation2] sm:$0xff] %v3754_v2  ;;  %555 = vst [vmem:[#allocation2 + $0x8] sm:$0xff] %v3754_v2 }
  0x8b   : > { %556 = vst [vmem:[#allocation2 + $0x10] sm:$0xff] %v3754_v2  ;;  %557 = vst [vmem:[#allocation2 + $0x18] sm:$0xff] %v3754_v2 }
  0x8c PF: > { %v3325_v3 = vld [vmem:[%s3948_s29 + $0x15c] ss:$24 sps:$4 sm:$0xff]   ;;  %v3327_v4 = vld [vmem:[%s3948_s29 + $0x158] ss:$24 sps:$4 sm:$0xff]   ;;  %v3755_v5 = vmov 0   ;;  %v3756_v39 = vmov 0.0   ;;  %v624_v40 = vlaneseq }
  0x8d   : > { %969 = vmatprep.mubr.bf16.mxu1 %v3755_v5  ;;  %926 = vmatprep.mubr.bf16.mxu0 %v3755_v5  ;;  %v3328_v6 = vld [vmem:[%s3948_s29 + $0x154] ss:$24 sps:$4 sm:$0xff]   ;;  %v3330_v7 = vld [vmem:[%s3948_s29 + $0x150] ss:$24 sps:$4 sm:$0xff]   ;;  %v3334_v10 = vld [vmem:[%s3948_s29 + $0x124] ss:$24 sps:$4 sm:$0xff]  }
  0x8e   : > { %937 = vmatprep.subr.bf16.mxu1 %v3325_v3  ;;  %3323 = vset.pattern.permute.xlu0 %v3755_v5  ;;  %v3331_v8 = vld [vmem:[%s3948_s29 + $0x12c] ss:$24 sps:$4 sm:$0xff]   ;;  %v3333_v9 = vld [vmem:[%s3948_s29 + $0x128] ss:$24 sps:$4 sm:$0xff]   ;;  %v3337_v12 = vld [vmem:[%s3948_s29 + $0xfc] ss:$24 sps:$4 sm:$0xff]  }
  0x8f   : > { %938 = vmatpush1.bf16.msra.mxu1 %v3327_v4  ;;  %3324 = vset.pattern.permute.xlu1 %v3755_v5  ;;  %v3336_v11 = vld [vmem:[%s3948_s29 + $0x120] ss:$24 sps:$4 sm:$0xff]   ;;  %v3340_v14 = vld [vmem:[%s3948_s29 + $0xf4] ss:$24 sps:$4 sm:$0xff]   ;;  %v3342_v16 = vld [vmem:[%s3948_s29 + $0xf0] ss:$24 sps:$4 sm:$0xff]  }
  0x90   : > { %894 = vmatprep.subr.bf16.mxu0 %v3328_v6  ;;  %939 = vmatprep.subr.bf16.mxu1 %v3331_v8  ;;  %v3339_v13 = vld [vmem:[%s3948_s29 + $0xf8] ss:$24 sps:$4 sm:$0xff]   ;;  %v3343_v15 = vld [vmem:[%s3948_s29 + $0xcc] ss:$24 sps:$4 sm:$0xff]   ;;  %v3345_v18 = vld [vmem:[%s3948_s29 + $0xc8] ss:$24 sps:$4 sm:$0xff]  }
  0x91   : > { %895 = vmatpush1.bf16.msra.mxu0 %v3330_v7  ;;  %v3346_v17 = vld [vmem:[%s3948_s29 + $0xc4] ss:$24 sps:$4 sm:$0xff]   ;;  %v3348_v20 = vld [vmem:[%s3948_s29 + $0xc0] ss:$24 sps:$4 sm:$0xff]   ;;  %v3352_v21 = vld [vmem:[%s3948_s29 + $0x94] ss:$24 sps:$4 sm:$0xff]  }
  0x92   : > { %896 = vmatprep.subr.bf16.mxu0 %v3334_v10  ;;  %v3349_v19 = vld [vmem:[%s3948_s29 + $0x9c] ss:$24 sps:$4 sm:$0xff]   ;;  %v3351_v22 = vld [vmem:[%s3948_s29 + $0x98] ss:$24 sps:$4 sm:$0xff]   ;;  %v3355_v23 = vld [vmem:[%s3948_s29 + $0x6c] ss:$24 sps:$4 sm:$0xff]  }
  0x93   : > { %940 = vmatpush1.bf16.msra.mxu1 %v3333_v9  ;;  %v3354_v24 = vld [vmem:[%s3948_s29 + $0x90] ss:$24 sps:$4 sm:$0xff]   ;;  %v3358_v25 = vld [vmem:[%s3948_s29 + $0x64] ss:$24 sps:$4 sm:$0xff]   ;;  %v3360_v28 = vld [vmem:[%s3948_s29 + $0x60] ss:$24 sps:$4 sm:$0xff]  }
  0x94   : > { %941 = vmatprep.subr.bf16.mxu1 %v3337_v12  ;;  %v3357_v26 = vld [vmem:[%s3948_s29 + $0x68] ss:$24 sps:$4 sm:$0xff]   ;;  %v3361_v27 = vld [vmem:[%s3948_s29 + $0x3c] ss:$24 sps:$4 sm:$0xff]   ;;  %v3363_v29 = vld [vmem:[%s3948_s29 + $0x38] ss:$24 sps:$4 sm:$0xff]  }
  0x95   : > { %897 = vmatpush1.bf16.msra.mxu0 %v3336_v11  ;;  %v3364_v30 = vld [vmem:[%s3948_s29 + $0x34] ss:$24 sps:$4 sm:$0xff]   ;;  %v3366_v32 = vld [vmem:[%s3948_s29 + $0x30] ss:$24 sps:$4 sm:$0xff]   ;;  %v3370_v33 = vld [vmem:[%s3948_s29 + $0x4] ss:$24 sps:$4 sm:$0xff]  }
  0x96   : > { %898 = vmatprep.subr.bf16.mxu0 %v3340_v14  ;;  %v3367_v31 = vld [vmem:[%s3948_s29 + $0xc] ss:$24 sps:$4 sm:$0xff]   ;;  %v3369_v34 = vld [vmem:[%s3948_s29 + $0x8] ss:$24 sps:$4 sm:$0xff]   ;;  %vm3757_vm0 = vmmov 0   ;;  %v4028_v41 = vshrl.u32 %v624_v40, 7 }
  0x97   : > { %942 = vmatpush1.bf16.msra.mxu1 %v3339_v13  ;;  %v4013_v35 = vld [vmem:[#allocation12] sm:$0xff]  ;;  %v4015_v36 = vld [vmem:[#allocation12 + $0x8] sm:$0xff]  ;;  %s4372_s30 = sld [smem:[#allocation23_spill]]  ;;  %vm1121_vm1 = vcmask 64512   ;;  %vm1149_vm2 = vcmask 1043456   ;;  %p3262_p7 = scmp.eq.s32.totalorder %s3835_s11, 1 }
  0x98   : > { %943 = vmatprep.subr.bf16.mxu1 %v3343_v15  ;;  %v3372_v37 = vld [vmem:[%s3948_s29] ss:$24 sps:$4 sm:$0xff]   ;;  %v4020_v38 = vpack.c.bf16 %v4015_v36, %v4013_v35  ;;  %v634_v45 = vsub.s32 2, %v4028_v41  ;;  %v626_v46 = vsub.s32 0, %v4028_v41  ;;  %v3375_v0 = vld [vmem:[%s3948_s29 + $0x164] ss:$24 sps:$4 sm:$0xff]  }
  0x99   : > { %899 = vmatpush1.bf16.msra.mxu0 %v3342_v16  ;;  %v564_v42 = vld [vmem:[%s3969_s4] ss:$8 sm:$0xf]  ;;  %v3378_v1 = vld [vmem:[%s3948_s29 + $0x134] ss:$24 sps:$4 sm:$0xff]  }
  0x9a   : > { %900 = vmatprep.subr.bf16.mxu0 %v3346_v17  ;;  %v565_v43 = vld [vmem:[%s3969_s4] ss:$8 sm:$0x30]  ;;  %v3381_v3 = vld [vmem:[%s3948_s29 + $0x104] ss:$24 sps:$4 sm:$0xff]  }
  0x9b   : > { %944 = vmatpush1.bf16.msra.mxu1 %v3345_v18  ;;  %v4032_v44 = vor.u32 %v565_v43, %v564_v42  ;;  %v3373_v63 = vld [vmem:[%s3948_s29 + $0x160] ss:$24 sps:$4 sm:$0xff]   ;;  %v3376_v2 = vld [vmem:[%s3948_s29 + $0x130] ss:$24 sps:$4 sm:$0xff]   ;;  %v3387_v7 = vld [vmem:[%s3948_s29 + $0xa4] ss:$24 sps:$4 sm:$0xff]  }
  0x9c   : > { %945 = vmatprep.subr.bf16.mxu1 %v3349_v19  ;;  %v3379_v4 = vld [vmem:[%s3948_s29 + $0x100] ss:$24 sps:$4 sm:$0xff]   ;;  %v3382_v6 = vld [vmem:[%s3948_s29 + $0xd0] ss:$24 sps:$4 sm:$0xff]   ;;  %v3390_v9 = vld [vmem:[%s3948_s29 + $0x74] ss:$24 sps:$4 sm:$0xff]  }
  0x9d   : > { %901 = vmatpush1.bf16.msra.mxu0 %v3348_v20  ;;  %v635_v47 = vrot.slane %v4032_v44, %v634_v45  ;;  %v627_v49 = vrot.slane %v4032_v44, %v626_v46  ;;  %v3385_v8 = vld [vmem:[%s3948_s29 + $0xa0] ss:$24 sps:$4 sm:$0xff]   ;;  %v3388_v10 = vld [vmem:[%s3948_s29 + $0x70] ss:$24 sps:$4 sm:$0xff]   ;;  %v3393_v11 = vld [vmem:[%s3948_s29 + $0x44] ss:$24 sps:$4 sm:$0xff]   ;;  %s4373_s25 = smov %s4372_s30 }
  0x9e   : > { %902 = vmatprep.subr.bf16.mxu0 %v3352_v21  ;;  %v3391_v12 = vld [vmem:[%s3948_s29 + $0x40] ss:$24 sps:$4 sm:$0xff]   ;;  %v3396_v13 = vld [vmem:[%s3948_s29 + $0x14] ss:$24 sps:$4 sm:$0xff]   ;;  %v3394_v14 = vld [vmem:[%s3948_s29 + $0x10] ss:$24 sps:$4 sm:$0xff]  }
  0x9f   : > { %946 = vmatpush1.bf16.msra.mxu1 %v3351_v22  ;;  %v4070_v16 = vld [vmem:[%s4372_s30] ss:$0 sm:$0xff] }
  0xa0   : > { %947 = vmatprep.subr.bf16.mxu1 %v3355_v23  ;;  %v4077_v23 = vld [vmem:[%s4373_s25 + $0x1] ss:$0 sm:$0xff] }
  0xa1   : > { %903 = vmatpush1.bf16.msra.mxu0 %v3354_v24 }
  0xa2   : > { %904 = vmatprep.subr.bf16.mxu0 %v3358_v25 }
  0xa3   : > { %948 = vmatpush1.bf16.msra.mxu1 %v3357_v26 }
  0xa4   : > { %949 = vmatprep.subr.bf16.mxu1 %v3361_v27 }
  0xa5   : > { %905 = vmatpush1.bf16.msra.mxu0 %v3360_v28 }
  0xa6   : > { %906 = vmatprep.subr.bf16.mxu0 %v3364_v30  ;;  %v642_v30 = vsub.s32 4, %v4028_v41 }
  0xa7   : > { %950 = vmatpush1.bf16.msra.mxu1 %v3363_v29 }
  0xa8   : > { %951 = vmatprep.subr.bf16.mxu1 %v3367_v31  ;;  %v643_v31 = vrot.slane %v4032_v44, %v642_v30 }
  0xa9   : > { %907 = vmatpush1.bf16.msra.mxu0 %v3366_v32 }
  0xaa   : > { %908 = vmatprep.subr.bf16.mxu0 %v3370_v33 }
  0xab   : > { %952 = vmatpush1.bf16.msra.mxu1 %v3369_v34 }
  0xac   : > { %3134 = vmatprep.subr.bf16.mxu1 %v3756_v39 }
  0xad   : > { %909 = vmatpush1.bf16.msra.mxu0 %v3372_v37 }
  0xae   : > { %970 = vmatmul.mubr.bf16.vlgmr.msra.gmra.mxu1 %v4020_v38  ;;  %980 = vmatprep.subr.bf16.mxu0 %v3375_v0 }
  0xaf   : > { %3136 = vmatprep.mubr.msk.bf16.mxu1 %vm3757_vm0, %v3756_v39 }
  0xb0   : > { %927 = vmatmul.mubr.bf16.vlgmr.msra.gmra.mxu0 %v4020_v38 }
  0xb1   : > { %1012 = vmatprep.mubr.bf16.mxu0 %v3755_v5  ;;  %981 = vmatpush1.bf16.msra.mxu0 %v3373_v63  ;;  %v3384_v5 = vld [vmem:[%s3948_s29 + $0xd4] ss:$24 sps:$4 sm:$0xff]   ;;  %s4374_s29 = sld [smem:[#allocation24_spill]] }
  0xb2   : > { %982 = vmatprep.subr.bf16.mxu0 %v3378_v1 }
  0xb5   : > { %983 = vmatpush1.bf16.msra.mxu0 %v3376_v2 }
  0xb6   : > { %984 = vmatprep.subr.bf16.mxu0 %v3381_v3 }
  0xb7   : > { %s4375_s18 = smov %s4374_s29 }
  0xb9   : > { %985 = vmatpush1.bf16.msra.mxu0 %v3379_v4  ;;  %v638_v4 = vsub.s32 3, %v4028_v41 }
  0xba   : > { %986 = vmatprep.subr.bf16.mxu0 %v3384_v5 }
  0xbd   : > { %987 = vmatpush1.bf16.msra.mxu0 %v3382_v6 }
  0xbe   : > { %988 = vmatprep.subr.bf16.mxu0 %v3387_v7  ;;  %v639_v7 = vrot.slane %v4032_v44, %v638_v4  ;;  %v3406_v4 = vld [vmem:[%s3955_s22 + $0x18] sm:$0xff]  }
  0xc1   : > { %989 = vmatpush1.bf16.msra.mxu0 %v3385_v8  ;;  %v630_v8 = vsub.s32 1, %v4028_v41 }
  0xc2   : > { %990 = vmatprep.subr.bf16.mxu0 %v3390_v9 }
  0xc5   : > { %991 = vmatpush1.bf16.msra.mxu0 %v3388_v10 }
  0xc6   : > { %992 = vmatprep.subr.bf16.mxu0 %v3393_v11 }
  0xc9   : > { %993 = vmatpush1.bf16.msra.mxu0 %v3391_v12  ;;  %v631_v12 = vrot.slane %v4032_v44, %v630_v8 }
  0xca   : > { %994 = vmatprep.subr.bf16.mxu0 %v3396_v13 }
  0xcd   : > { %995 = vmatpush1.bf16.msra.mxu0 %v3394_v14 }
  0xd0   : > { %1013 = vmatmul.mubr.bf16.vlgmr.msra.gmra.mxu0 %v4020_v38 }
 0x16e   : > { %v971_v48 = vpop.f32.mrf.mxu1 }
 0x16f   : > { %v972_v50 = vadd.f32 %v971_v48, %v635_v47 }
 0x170   : > { %v4038_v51 = vpop.f32.mrf.mxu1  ;;  %v928_v53 = vpop.f32.mrf.mxu0 }
 0x171   : > { %v1025_v52 = vpack.c.bf16 %v972_v50, %v972_v50  ;;  %v929_v54 = vadd.f32 %v928_v53, %v627_v49  ;;  %v646_v53 = vsub.s32 5, %v4028_v41  ;;  %v974_v10 = vadd.f32 %v4038_v51, %v639_v7 }
 0x172   : > { %v975_v55 = vpop.f32.mrf.mxu1  ;;  %v4041_v58 = vpop.f32.mrf.mxu0 }
 0x173   : > { %3135 = vmatpush3.bf16.xpose.msra.mxu1 %v1025_v52  ;;  %v976_v56 = vadd.f32 %v975_v55, %v635_v47  ;;  %v1023_v57 = vpack.c.bf16 %v929_v54, %v929_v54  ;;  %v647_v55 = vrot.slane %v4032_v44, %v646_v53  ;;  %v1241_v14 = vpack.c.bf16 %v974_v10, %v974_v10 }
 0x174   : > { %3140 = vmatprep.subr.bf16.mxu1 %v3756_v39  ;;  %v932_v60 = vpop.f32.mrf.mxu0  ;;  %v4065_v15 = vpop.f32.mrf.mxu1 }
 0x175   : > { %v1026_v59 = vpack.c.bf16 %v976_v56, %v976_v56  ;;  %v933_v61 = vadd.f32 %v932_v60, %v627_v49  ;;  %v978_v41 = vadd.f32 %v4065_v15, %v639_v7 }
 0x176   : > { %v4083_v32 = vpop.f32.mrf.mxu0 }
 0x177   : > { %v1024_v62 = vpack.c.bf16 %v933_v61, %v933_v61  ;;  %v935_v44 = vadd.f32 %v4083_v32, %v631_v12 }
 0x17a   : > { %3137 = vmatmul.mubr.bf16.vlgmr.msra.gmra.mxu1 %v1023_v57 }
 0x17b   : > { %3141 = vmatpush3.bf16.xpose.msra.mxu1 %v1026_v59  ;;  %3142 = vmatprep.mubr.msk.bf16.mxu1 %vm3757_vm0, %v3756_v39 }
 0x17c   : > { %3146 = vmatprep.subr.bf16.mxu1 %v3756_v39 }
 0x182   : > { %3143 = vmatmul.mubr.bf16.vlgmr.msra.gmra.mxu1 %v1024_v62 }
 0x183   : > { %3148 = vmatprep.mubr.msk.bf16.mxu1 %vm3757_vm0, %v3756_v39 }
 0x190   : > { %v1014_v33 = vpop.f32.mrf.mxu0 }
 0x191   : > { %v1015_v34 = vadd.f32 %v1014_v33, %v643_v31 }
 0x192   : > { %v1016_v54 = vpop.f32.mrf.mxu0 }
 0x193   : > { %v1027_v37 = vpack.c.bf16 %v1015_v34, %v1015_v34  ;;  %v1017_v51 = vadd.f32 %v1016_v54, %v647_v55 }
 0x194   : > { %v1018_v56 = vpop.f32.mrf.mxu0 }
 0x195   : > { %v1151_v38 = vsel %vm1149_vm2, %v1027_v37, 0  ;;  %v1019_v57 = vadd.f32 %v1018_v56, %v643_v31 }
 0x196   : > { %3147 = vmatpush3.bf16.msra.mxu1 %v1151_v38  ;;  %v1020_v59 = vpop.f32.mrf.mxu0 }
 0x197   : > { %3152 = vmatprep.subr.bf16.mxu1 %v3756_v39  ;;  %v1028_v60 = vpack.c.bf16 %v1019_v57, %v1019_v57  ;;  %v1021_v61 = vadd.f32 %v1020_v59, %v647_v55  ;;  %v3397_v57 = vld [vmem:[%s3955_s22 + $0x78] sm:$0xff]  }
 0x198   : > { %v3398_v59 = vld [vmem:[%s3955_s22 + $0x38] sm:$0xff]   ;;  %3006 = vmatprep.subr.bf16.mxu0 %v3397_v57  ;;  %v3428_v57 = vld [vmem:[%s3961_s10 + $0xa0] sm:$0xff]  }
 0x199   : > { %v1197_v62 = vsel %vm1149_vm2, %v1028_v60, 0  ;;  %v1244_v63 = vpack.c.bf16 %v1021_v61, %v1021_v61  ;;  %v3399_v60 = vld [vmem:[%s3955_s22 + $0x70] sm:$0xff]   ;;  %3007 = vmatpush3.bf16.msra.mxu0 %v3398_v59  ;;  %v3429_v59 = vld [vmem:[%s3961_s10 + $0x58] sm:$0xff]  }
 0x19a   : > { %v3400_v61 = vld [vmem:[%s3955_s22 + $0x30] sm:$0xff]   ;;  %3008 = vmatprep.subr.bf16.mxu0 %v3399_v60  ;;  %v3430_v60 = vld [vmem:[%s3961_s10 + $0xd8] sm:$0xff]  }
 0x19b   : > { %v4093_v0 = vsel %vm1149_vm2, %v1244_v63, 0  ;;  %v3402_v63 = vld [vmem:[%s3955_s22 + $0x28] sm:$0xff]  }
 0x19d   : > { %3009 = vmatpush3.bf16.msra.mxu0 %v3400_v61  ;;  %v3431_v61 = vld [vmem:[%s3961_s10 + $0x18] sm:$0xff]  }
 0x23a   : > { %v1075_v17 = vpop.f32.mrf.mxu1 }
 0x23b   : > { %v1076_v18 = vadd.f32 %v4070_v16, %v1075_v17  ;;  %v931_v17 = vadd.f32 %v4041_v58, %v631_v12 }
 0x23c   : > { %v3138_v19 = vpop.f32.mrf.mxu1 }
 0x23d   : > { %v1122_v20 = vsel %vm1121_vm1, %v1076_v18, -inf  ;;  %v1242_v19 = vpack.c.bf16 %v978_v41, %v978_v41  ;;  %v3410_v41 = vld [vmem:[%s3955_s22 + $0x8] sm:$0xff]  }
 0x23e   : > { %1123 = vmax.xlane.f32.xlu0 %v1122_v20  ;;  %v1078_v21 = vpop.f32.mrf.mxu1  ;;  %v1243_v20 = vpack.c.bf16 %v1017_v51, %v1017_v51 }
 0x23f   : > { %v1240_v21 = vpack.c.bf16 %v935_v44, %v935_v44 }
 0x240   : > { %v3139_v22 = vpop.f32.mrf.mxu1  ;;  %v1353_v58 = vsel %vm1149_vm2, %v1243_v20, 0 }
 0x242   : > { %v1115_v24 = vpop.f32.mrf.mxu1 }
 0x243   : > { %v1116_v25 = vadd.f32 %v4077_v23, %v1115_v24 }
 0x244   : > { %v3144_v26 = vpop.f32.mrf.mxu1 }
 0x245   : > { %v1125_v27 = vsel %vm1121_vm1, %v1116_v25, -inf }
 0x246   : > { %1126 = vmax.xlane.f32.xlu0 %v1125_v27  ;;  %v1118_v28 = vpop.f32.mrf.mxu1 }
 0x248   : > { %v3145_v29 = vpop.f32.mrf.mxu1 }
 0x2c7   : > { %v1124_v40 = vpop.xlane.xlu0 %1123 }
 0x2c8   : > { %v1128_v42 = vsub.f32 %v1076_v18, %v1124_v40  ;;  %v1239_v18 = vpack.c.bf16 %v931_v17, %v931_v17  ;;  %v3409_v17 = vld [vmem:[%s3955_s22 + $0x48] sm:$0xff]  }
 0x2ca   : > { %v1130_v43 = vmul.f32 1.442695, %v1128_v42 }
 0x2cc   : > { %3493 = vpow2.f32 %v1130_v43 }
 0x2cf   : > { %v1127_v45 = vpop.xlane.xlu0 %1126 }
 0x2d0   : > { %v1129_v46 = vsub.f32 %v1116_v25, %v1127_v45 }
 0x2d2   : > { %v1132_v47 = vmul.f32 1.442695, %v1129_v46 }
 0x2d4   : > { %3495 = vpow2.f32 %v1132_v47 }
 0x2d9   : > { %v3494_v48 = vpop.eup %3493 }
 0x2da   : > { %v1134_v49 = vsel %vm1121_vm1, %v3494_v48, 0.0 }
 0x2db   : > { %1135 = vadd.xlane.f32.xlu1 %v1134_v49 }
 0x2e1   : > { %v3496_v50 = vpop.eup %3495 }
 0x2e2   : > { %v1137_v52 = vsel %vm1121_vm1, %v3496_v50, 0.0 }
 0x2e3   : > { %1138 = vadd.xlane.f32.xlu1 %v1137_v52 }
 0x364   : > { %v1136_v1 = vpop.xlane.xlu1 %1135 }
 0x365   : > { %3497 = vrcp.f32 %v1136_v1  ;;  %v3403_v1 = vld [vmem:[%s3955_s22 + $0x60] sm:$0xff]  }
 0x36c   : > { %v1139_v2 = vpop.xlane.xlu1 %1138 }
 0x36d   : > { %3499 = vrcp.f32 %v1139_v2  ;;  %v3404_v2 = vld [vmem:[%s3955_s22 + $0x20] sm:$0xff]  }
 0x372   : > { %v3498_v3 = vpop.eup %3497 }
 0x373   : > { %v1142_v5 = vmul.f32 %v3498_v3, %v3494_v48  ;;  %v3405_v3 = vld [vmem:[%s3955_s22 + $0x58] sm:$0xff]  }
 0x375   : > { %v1144_v6 = vpack.c.bf16 %v1142_v5, %v1142_v5 }
 0x377   : > { %3149 = vmatmul.mubr.msk.bf16.vlgmr.msra.gmra.mxu1 %vm1121_vm1, %v1144_v6 }
 0x378   : > { %3153 = vmatpush3.bf16.msra.mxu1 %v1197_v62  ;;  %3154 = vmatprep.mubr.msk.bf16.mxu1 %vm3757_vm0, %v3756_v39  ;;  %v3401_v62 = vld [vmem:[%s3955_s22 + $0x68] sm:$0xff]  }
 0x379   : > { %3158 = vmatprep.subr.bf16.mxu1 %v3756_v39  ;;  %3010 = vmatprep.subr.bf16.mxu0 %v3401_v62  ;;  %v3432_v62 = vld [vmem:[%s3961_s10 + $0x98] sm:$0xff]  }
 0x37a   : > { %v3500_v9 = vpop.eup %3499  ;;  %3011 = vmatpush3.bf16.msra.mxu0 %v3402_v63  ;;  %v3433_v63 = vld [vmem:[%s3961_s10 + $0x50] sm:$0xff]  }
 0x37b   : > { %v1143_v11 = vmul.f32 %v3500_v9, %v3496_v50  ;;  %3012 = vmatprep.subr.bf16.mxu0 %v3403_v1  ;;  %v3434_v1 = vld [vmem:[%s3961_s10 + $0xd0] sm:$0xff]  }
 0x37d   : > { %v1145_v13 = vpack.c.bf16 %v1143_v11, %v1143_v11 }
 0x37e   : > { %3013 = vmatpush3.bf16.msra.mxu0 %v3404_v2  ;;  %v3435_v2 = vld [vmem:[%s3961_s10 + $0x10] sm:$0xff]  }
 0x37f   : > { %3155 = vmatmul.mubr.msk.bf16.vlgmr.msra.gmra.mxu1 %vm1121_vm1, %v1145_v13  ;;  %3014 = vmatprep.subr.bf16.mxu0 %v3405_v3  ;;  %v3407_v13 = vld [vmem:[%s3955_s22 + $0x50] sm:$0xff]  }
 0x380   : > { %3159 = vmatpush3.bf16.xpose.msra.mxu1 %v1241_v14  ;;  %3160 = vmatprep.mubr.msk.bf16.mxu1 %vm3757_vm0, %v3756_v39  ;;  %v3408_v14 = vld [vmem:[%s3955_s22 + $0x10] sm:$0xff]  }
 0x381   : > { %3164 = vmatprep.subr.bf16.mxu1 %v3756_v39  ;;  %v3436_v3 = vld [vmem:[%s3961_s10 + $0x90] sm:$0xff]  }
 0x382   : > { %3015 = vmatpush3.bf16.msra.mxu0 %v3406_v4  ;;  %v3437_v4 = vld [vmem:[%s3961_s10 + $0x48] sm:$0xff]  }
 0x383   : > { %3016 = vmatprep.subr.bf16.mxu0 %v3407_v13  ;;  %v3446_v13 = vld [vmem:[%s3961_s10 + $0x1f8] sm:$0xff]  }
 0x386   : > { %3017 = vmatpush3.bf16.msra.mxu0 %v3408_v14 }
 0x387   : > { %3161 = vmatmul.mubr.bf16.vlgmr.msra.gmra.mxu1 %v1239_v18  ;;  %3018 = vmatprep.subr.bf16.mxu0 %v3409_v17  ;;  %v3411_v18 = vld [vmem:[%s3955_s22 + $0x40] sm:$0xff]  }
 0x388   : > { %3165 = vmatpush3.bf16.xpose.msra.mxu1 %v1242_v19  ;;  %3166 = vmatprep.mubr.msk.bf16.mxu1 %vm3757_vm0, %v3756_v39  ;;  %v3412_v19 = vld [vmem:[%s3955_s22] sm:$0xff]   ;;  %s3758_s22 = smov [#allocation12]  }
 0x389   : > { %3170 = vmatprep.subr.bf16.mxu1 %v3756_v39  ;;  %s2623_s21 = sshll.u32 %s3758_s22, 4  ;;  %s2624_s21 = int_to_ptr.vmem [resolvable:$true] %s2623_s21 }
 0x38a   : > { %3019 = vmatpush3.bf16.msra.mxu0 %v3410_v41  ;;  %s3657_s2 = scalar_lea.vmem %s2624_s21, 256  ;;  %p3664_p5 = scmp.lt.s32.totalorder %s2624_s21, %s2624_s21 }
 0x38b   : > { %3020 = vmatprep.subr.bf16.mxu0 %v3411_v18  ;;  %p3658_p11 = scmp.ne.s32.totalorder %s2624_s21, %s3657_s2  ;;  %p3665_p8 = scmp.lt.s32.totalorder %s3657_s2, %s3657_s2 }
 0x38d   : > { %p3659_p6 = pnand %p3658_p11, %p3262_p7  ;;  %p3666_p12 = por %p3665_p8, %p3664_p5 }
 0x38e   : > { %3021 = vmatpush3.bf16.msra.mxu0 %v3412_v19 }
 0x38f   : > { %3167 = vmatmul.mubr.bf16.vlgmr.msra.gmra.mxu1 %v1240_v21  ;;  %p3660_p4 = pneg %p3659_p6 }
 0x390   : > { %3171 = vmatpush3.bf16.msra.mxu1 %v1353_v58  ;;  %3172 = vmatprep.mubr.msk.bf16.mxu1 %vm3757_vm0, %v3756_v39 }
 0x391   : > { %3176 = vmatprep.subr.bf16.mxu1 %v3756_v39  ;;  %p3667_p13 = pnand %p3666_p12, %p3660_p4 }
 0x437   : > { %v4118_v15 = vpop.f32.mrf.mxu1 }
 0x439   : > { %v3150_v22 = vpop.f32.mrf.mxu1 }
 0x43b   : > { %v1190_v24 = vpop.f32.mrf.mxu1 }
 0x43d   : > { %v3151_v25 = vpop.f32.mrf.mxu1 }
 0x43f   : > { %v4120_v26 = vpop.f32.mrf.mxu1 }
 0x440   : > { %v1441_v27 = vpack.c.bf16 %v4120_v26, %v4118_v15 }
 0x441   : > { %v3156_v28 = vpop.f32.mrf.mxu1 }
 0x443   : > { %v1236_v29 = vpop.f32.mrf.mxu1 }
 0x444   : > { %v567_v29 = vld [vmem:[%s3969_s4 + $0x1] ss:$0 sm:$0xff] }
 0x445   : > { %v3157_v30 = vpop.f32.mrf.mxu1 }
 0x447   : > { %v1279_v31 = vpop.f32.mrf.mxu1 }
 0x448   : > { %v1280_v32 = vadd.f32 %v4070_v16, %v1279_v31 }
 0x449   : > { %v3162_v33 = vpop.f32.mrf.mxu1 }
 0x44a   : > { %v1325_v34 = vsel %vm1121_vm1, %v1280_v32, -inf }
 0x44b   : > { %1326 = vmax.xlane.f32.xlu0 %v1325_v34  ;;  %v1282_v37 = vpop.f32.mrf.mxu1 }
 0x44d   : > { %v3163_v38 = vpop.f32.mrf.mxu1 }
 0x44f   : > { %v1319_v40 = vpop.f32.mrf.mxu1 }
 0x450   : > { %v1320_v42 = vadd.f32 %v4077_v23, %v1319_v40 }
 0x451   : > { %v3168_v43 = vpop.f32.mrf.mxu1 }
 0x452   : > { %v1328_v45 = vsel %vm1121_vm1, %v1320_v42, -inf  ;;  %v3414_v43 = vld [vmem:[%s3961_s10 + $0xf8] sm:$0xff]  }
 0x453   : > { %1329 = vmax.xlane.f32.xlu1 %v1328_v45  ;;  %v1322_v46 = vpop.f32.mrf.mxu1  ;;  %v3415_v45 = vld [vmem:[%s3961_s10 + $0x38] sm:$0xff]   ;;  %3050 = vmatprep.subr.bf16.mxu0 %v3414_v43 }
 0x454   : > { %v3416_v46 = vld [vmem:[%s3961_s10 + $0xb8] sm:$0xff]  }
 0x455   : > { %v3169_v47 = vpop.f32.mrf.mxu1 }
 0x456   : > { %v3417_v47 = vld [vmem:[%s3961_s10 + $0x70] sm:$0xff]  }
 0x4d4   : > { %v1327_v48 = vpop.xlane.xlu0 %1326 }
 0x4d5   : > { %v1331_v16 = vsub.f32 %v1280_v32, %v1327_v48  ;;  %v3418_v48 = vld [vmem:[%s3961_s10 + $0xf0] sm:$0xff]  }
 0x4d7   : > { %v1333_v49 = vmul.f32 1.442695, %v1331_v16  ;;  %v3419_v16 = vld [vmem:[%s3961_s10 + $0x30] sm:$0xff]  }
 0x4d9   : > { %3501 = vpow2.f32 %v1333_v49  ;;  %v3420_v49 = vld [vmem:[%s3961_s10 + $0xb0] sm:$0xff]  }
 0x4dc   : > { %v1330_v50 = vpop.xlane.xlu1 %1329 }
 0x4dd   : > { %v1332_v52 = vsub.f32 %v1320_v42, %v1330_v50  ;;  %v3413_v42 = vld [vmem:[%s3961_s10 + $0x78] sm:$0xff]   ;;  %v3421_v50 = vld [vmem:[%s3961_s10 + $0x68] sm:$0xff]  }
 0x4df   : > { %v1335_v53 = vmul.f32 1.442695, %v1332_v52  ;;  %v3422_v52 = vld [vmem:[%s3961_s10 + $0xe8] sm:$0xff]  }
 0x4e1   : > { %3503 = vpow2.f32 %v1335_v53  ;;  %v3423_v53 = vld [vmem:[%s3961_s10 + $0x28] sm:$0xff]  }
 0x4e6   : > { %v3502_v23 = vpop.eup %3501 }
 0x4e7   : > { %v1337_v54 = vsel %vm1121_vm1, %v3502_v23, 0.0 }
 0x4e8   : > { %1338 = vadd.xlane.f32.xlu0 %v1337_v54  ;;  %v3425_v54 = vld [vmem:[%s3961_s10 + $0x60] sm:$0xff]  }
 0x4ee   : > { %v3504_v55 = vpop.eup %3503 }
 0x4ef   : > { %v1340_v56 = vsel %vm1121_vm1, %v3504_v55, 0.0 }
 0x4f0   : > { %1341 = vadd.xlane.f32.xlu1 %v1340_v56  ;;  %v3427_v56 = vld [vmem:[%s3961_s10 + $0x20] sm:$0xff]  }
 0x571   : > { %v1339_v5 = vpop.xlane.xlu0 %1338 }
 0x572   : > { %3505 = vrcp.f32 %v1339_v5  ;;  %v3438_v5 = vld [vmem:[%s3961_s10 + $0xc8] sm:$0xff]  }
 0x579   : > { %v1342_v6 = vpop.xlane.xlu1 %1341 }
 0x57a   : > { %3507 = vrcp.f32 %v1342_v6  ;;  %v3439_v6 = vld [vmem:[%s3961_s10 + $0x8] sm:$0xff]  }
 0x57f   : > { %v3506_v7 = vpop.eup %3505 }
 0x580   : > { %v1345_v8 = vmul.f32 %v3506_v7, %v3502_v23  ;;  %v3424_v23 = vld [vmem:[%s3961_s10 + $0xa8] sm:$0xff]  }
 0x581   : > { %v3440_v7 = vld [vmem:[%s3961_s10 + $0x88] sm:$0xff]  }
 0x582   : > { %v1347_v9 = vpack.c.bf16 %v1345_v8, %v1345_v8  ;;  %v3441_v8 = vld [vmem:[%s3961_s10 + $0x40] sm:$0xff]  }
 0x584   : > { %3173 = vmatmul.mubr.msk.bf16.vlgmr.msra.gmra.mxu1 %vm1121_vm1, %v1347_v9  ;;  %v3442_v9 = vld [vmem:[%s3961_s10 + $0xc0] sm:$0xff]  }
 0x585   : > { %3177 = vmatpush3.bf16.msra.mxu1 %v4093_v0  ;;  %3178 = vmatprep.mubr.msk.bf16.mxu1 %vm3757_vm0, %v3756_v39 }
 0x586   : > { %3028 = vmatprep.subr.bf16.mxu1 %v3413_v42 }
 0x587   : > { %v3508_v10 = vpop.eup %3507 }
 0x588   : > { %v1346_v11 = vmul.f32 %v3508_v10, %v3504_v55  ;;  %v3426_v55 = vld [vmem:[%s3961_s10 + $0xe0] sm:$0xff]  }
 0x589   : > { %v3443_v10 = vld [vmem:[%s3961_s10] sm:$0xff]  }
 0x58a   : > { %v1348_v12 = vpack.c.bf16 %v1346_v11, %v1346_v11  ;;  %v3444_v11 = vld [vmem:[%s3961_s10 + $0x80] sm:$0xff]  }
 0x58c   : > { %3179 = vmatmul.mubr.msk.bf16.vlgmr.msra.gmra.mxu1 %vm1121_vm1, %v1348_v12  ;;  %v3445_v12 = vld [vmem:[%s3961_s10 + $0x178] sm:$0xff]  }
 0x58d   : > { %3029 = vmatpush3.bf16.msra.mxu1 %v3415_v45 }
 0x58e   : > { %3030 = vmatprep.subr.bf16.mxu1 %v3417_v47 }
 0x591   : > { %3031 = vmatpush3.bf16.msra.mxu1 %v3419_v16 }
 0x592   : > { %3032 = vmatprep.subr.bf16.mxu1 %v3421_v50  ;;  %v3448_v50 = vld [vmem:[%s3961_s10 + $0x1b8] sm:$0xff]  }
 0x595   : > { %3033 = vmatpush3.bf16.msra.mxu1 %v3423_v53 }
 0x596   : > { %3034 = vmatprep.subr.bf16.mxu1 %v3425_v54 }
 0x599   : > { %3035 = vmatpush3.bf16.msra.mxu1 %v3427_v56 }
 0x59a   : > { %3036 = vmatprep.subr.bf16.mxu1 %v3429_v59 }
 0x59d   : > { %3037 = vmatpush3.bf16.msra.mxu1 %v3431_v61 }
 0x59e   : > { %3038 = vmatprep.subr.bf16.mxu1 %v3433_v63 }
 0x5a1   : > { %3039 = vmatpush3.bf16.msra.mxu1 %v3435_v2  ;;  %v3450_v2 = vld [vmem:[%s3961_s10 + $0x1f0] sm:$0xff]  }
 0x5a2   : > { %3040 = vmatprep.subr.bf16.mxu1 %v3437_v4 }
 0x5a5   : > { %3041 = vmatpush3.bf16.msra.mxu1 %v3439_v6  ;;  %v3452_v6 = vld [vmem:[%s3961_s10 + $0x1b0] sm:$0xff]  }
 0x5a6   : > { %3042 = vmatprep.subr.bf16.mxu1 %v3441_v8  ;;  %v3454_v8 = vld [vmem:[%s3961_s10 + $0x1e8] sm:$0xff]  }
 0x5a9   : > { %3043 = vmatpush3.bf16.msra.mxu1 %v3443_v10  ;;  %v3456_v10 = vld [vmem:[%s3961_s10 + $0x1a8] sm:$0xff]  }
 0x5aa   : > { %3072 = vmatprep.subr.bf16.mxu1 %v3445_v12  ;;  %v3458_v12 = vld [vmem:[%s3961_s10 + $0x1e0] sm:$0xff]  }
 0x644   : > { %v1389_v0 = vpop.f32.mrf.mxu1 }
 0x646   : > { %v3174_v51 = vpop.f32.mrf.mxu1 }
 0x648   : > { %v1392_v44 = vpop.f32.mrf.mxu1 }
 0x64a   : > { %v3175_v20 = vpop.f32.mrf.mxu1 }
 0x64c   : > { %v1435_v21 = vpop.f32.mrf.mxu1 }
 0x64d   : > { %v1442_v58 = vpack.c.bf16 %v1435_v21, %v1389_v0 }
 0x64e   : > { %v3180_v22 = vpop.f32.mrf.mxu1 }
 0x64f   : > { %1603 = vmatprep.mubr.bf16.mxu0 %v1442_v58 }
 0x650   : > { %v1438_v24 = vpop.f32.mrf.mxu1  ;;  %1604 = vmatmul.mubr.bf16.vlgmr.msra.gmra.mxu0 %v1441_v27 }
 0x651   : > { %3051 = vmatpush3.bf16.msra.mxu0 %v3416_v46 }
 0x652   : > { %v3181_v25 = vpop.f32.mrf.mxu1  ;;  %3052 = vmatprep.subr.bf16.mxu0 %v3418_v48 }
 0x655   : > { %3053 = vmatpush3.bf16.msra.mxu0 %v3420_v49  ;;  %v3447_v49 = vld [vmem:[%s3961_s10 + $0x138] sm:$0xff]  }
 0x656   : > { %3054 = vmatprep.subr.bf16.mxu0 %v3422_v52 }
 0x659   : > { %3055 = vmatpush3.bf16.msra.mxu0 %v3424_v23 }
 0x65a   : > { %3056 = vmatprep.subr.bf16.mxu0 %v3426_v55 }
 0x65d   : > { %3057 = vmatpush3.bf16.msra.mxu0 %v3428_v57 }
 0x65e   : > { %3058 = vmatprep.subr.bf16.mxu0 %v3430_v60 }
 0x661   : > { %3059 = vmatpush3.bf16.msra.mxu0 %v3432_v62  ;;  %v3449_v62 = vld [vmem:[%s3961_s10 + $0x170] sm:$0xff]  }
 0x662   : > { %3060 = vmatprep.subr.bf16.mxu0 %v3434_v1 }
 0x665   : > { %3061 = vmatpush3.bf16.msra.mxu0 %v3436_v3 }
 0x666   : > { %3062 = vmatprep.subr.bf16.mxu0 %v3438_v5  ;;  %v3451_v5 = vld [vmem:[%s3961_s10 + $0x130] sm:$0xff]  }
 0x669   : > { %3063 = vmatpush3.bf16.msra.mxu0 %v3440_v7  ;;  %v3453_v7 = vld [vmem:[%s3961_s10 + $0x168] sm:$0xff]  }
 0x66a   : > { %3064 = vmatprep.subr.bf16.mxu0 %v3442_v9  ;;  %v3455_v9 = vld [vmem:[%s3961_s10 + $0x128] sm:$0xff]  }
 0x66d   : > { %3065 = vmatpush3.bf16.msra.mxu0 %v3444_v11  ;;  %v3457_v11 = vld [vmem:[%s3961_s10 + $0x160] sm:$0xff]  }
 0x66e   : > { %3094 = vmatprep.subr.bf16.mxu0 %v3446_v13  ;;  %v3459_v13 = vld [vmem:[%s3961_s10 + $0x120] sm:$0xff]  }
 0x710   : > { %v3022_v28 = vpop.f32.mrf.mxu0 }
 0x712   : > { %v3023_v30 = vpop.f32.mrf.mxu0 }
 0x713   : > { %v3024_v31 = vadd.f32 %v3023_v30, %v3022_v28 }
 0x714   : > { %v3025_v32 = vpop.f32.mrf.mxu0 }
 0x715   : > { %v1606_v33 = vadd.f32 %v3024_v31, %v567_v29 }
 0x716   : > { %v3026_v34 = vpop.f32.mrf.mxu0 }
 0x717   : > { %v3027_v37 = vadd.f32 %v3026_v34, %v3025_v32  ;;  %v4156_v38 = vadd.f32 %v1606_v33, %v4013_v35  ;;  %v563_v35 = vld [vmem:[%s4374_s29 + $0x8] sm:$0xff]  ;;  %v568_v32 = vld [vmem:[%s3969_s4 + $0x2] ss:$0 sm:$0xff]  ;;  %v569_v34 = vld [vmem:[%s3969_s4 + $0x3] ss:$0 sm:$0xff] }
 0x719   : > { %v1609_v40 = vadd.f32 %v3027_v37, %v567_v29  ;;  %1614 = vadd.xlane.f32.xlu0 %v4156_v38  ;;  %v1620_v26 = vmul.f32 %v4156_v38, %v4156_v38 }
 0x71b   : > { %v4160_v15 = vadd.f32 %v1609_v40, %v4015_v36  ;;  %v562_v36 = vld [vmem:[%s4375_s18] sm:$0xff] }
 0x71d   : > { %1616 = vadd.xlane.f32.xlu1 %v4160_v15  ;;  %1622 = vadd.xlane.f32.xlu0 %v1620_v26  ;;  %v1621_v27 = vmul.f32 %v4160_v15, %v4160_v15 }
 0x721   : > { %1624 = vadd.xlane.f32.xlu1 %v1621_v27 }
 0x732   : > { %1653 = vperm.xlu1 %3324, %v563_v35  }
 0x733   : > { %1648 = vperm.xlu0 %3323, %v562_v36  }
 0x7a2   : > { %v1615_v14 = vpop.xlane.xlu0 %1614 }
 0x7a3   : > { %v1618_v17 = vmul.f32 0.03125, %v1615_v14  ;;  %v3460_v14 = vld [vmem:[%s3961_s10 + $0x1a0] sm:$0xff]  }
 0x7a5   : > { %v1628_v19 = vmul.f32 %v1618_v17, %v1618_v17  ;;  %v1634_v30 = vsub.f32 %v4156_v38, %v1618_v17  ;;  %v3461_v17 = vld [vmem:[%s3961_s10 + $0x158] sm:$0xff]  }
 0x7a6   : > { %v1617_v41 = vpop.xlane.xlu1 %1616  ;;  %v1623_v18 = vpop.xlane.xlu0 %1622 }
 0x7a7   : > { %v1619_v0 = vmul.f32 0.03125, %v1617_v41  ;;  %v1626_v51 = vmul.f32 0.03125, %v1623_v18  ;;  %v3462_v41 = vld [vmem:[%s3961_s10 + $0x1d8] sm:$0xff]  }
 0x7a8   : > { %v3463_v18 = vld [vmem:[%s3961_s10 + $0x118] sm:$0xff]  }
 0x7a9   : > { %v1630_v44 = vsub.f32 %v1626_v51, %v1628_v19  ;;  %v1629_v21 = vmul.f32 %v1619_v0, %v1619_v0  ;;  %v1635_v37 = vsub.f32 %v4160_v15, %v1619_v0  ;;  %v3464_v19 = vld [vmem:[%s3961_s10 + $0x198] sm:$0xff]   ;;  %v3465_v0 = vld [vmem:[%s3961_s10 + $0x150] sm:$0xff]  }
 0x7aa   : > { %v1625_v20 = vpop.xlane.xlu1 %1624  ;;  %v3466_v51 = vld [vmem:[%s3961_s10 + $0x1d0] sm:$0xff]  }
 0x7ab   : > { %v1632_v58 = vmax.f32 %v1630_v44, 0.0  ;;  %v1627_v22 = vmul.f32 0.03125, %v1625_v20  ;;  %v3467_v44 = vld [vmem:[%s3961_s10 + $0x110] sm:$0xff]  }
 0x7ac   : > { %v3468_v20 = vld [vmem:[%s3961_s10 + $0x190] sm:$0xff]  }
 0x7ad   : > { %v1636_v24 = vadd.f32 1e-05, %v1632_v58  ;;  %v1631_v25 = vsub.f32 %v1627_v22, %v1629_v21  ;;  %v3469_v21 = vld [vmem:[%s3961_s10 + $0x148] sm:$0xff]  }
 0x7ae   : > { %v4211_v27 = vpop.permute.xlu0 %1648  ;;  %v4216_v45 = vpop.permute.xlu1 %1653  ;;  %v3470_v58 = vld [vmem:[%s3961_s10 + $0x1c8] sm:$0xff]  }
 0x7af   : > { %3509 = vrsqrt.f32 %v1636_v24  ;;  %v1633_v28 = vmax.f32 %v1631_v25, 0.0  ;;  %v3471_v22 = vld [vmem:[%s3961_s10 + $0x108] sm:$0xff]   ;;  %v3473_v25 = vld [vmem:[%s3961_s10 + $0x140] sm:$0xff]  }
 0x7b0   : > { %v3472_v24 = vld [vmem:[%s3961_s10 + $0x188] sm:$0xff]  }
 0x7b1   : > { %v1637_v29 = vadd.f32 1e-05, %v1633_v28  ;;  %v3474_v28 = vld [vmem:[%s3961_s10 + $0x1c0] sm:$0xff]  }
 0x7b3   : > { %3511 = vrsqrt.f32 %v1637_v29  ;;  %v3475_v29 = vld [vmem:[%s3961_s10 + $0x100] sm:$0xff]  }
 0x7bc   : > { %v3510_v31 = vpop.eup %3509 }
 0x7bd   : > { %v1640_v33 = vmul.f32 %v3510_v31, %v1634_v30  ;;  %v3476_v30 = vld [vmem:[%s3961_s10 + $0x180] sm:$0xff]  }
 0x7bf   : > { %v1642_v40 = vmul.f32 %v1640_v33, %v568_v32  ;;  %v3477_v33 = vld [vmem:[%s3961_s10 + $0x238] sm:$0xff]  }
 0x7c0   : > { %v3512_v26 = vpop.eup %3511 }
 0x7c1   : > { %v1644_v35 = vadd.f32 %v1642_v40, %v569_v34  ;;  %v1641_v36 = vmul.f32 %v3512_v26, %v1635_v37  ;;  %v3478_v40 = vld [vmem:[%s3961_s10 + $0x230] sm:$0xff]   ;;  %v3479_v26 = vld [vmem:[%s3961_s10 + $0x228] sm:$0xff]  }
 0x7c3   : > { %v4214_v42 = vmul.f32 %v4211_v27, %v1644_v35  ;;  %v1643_v43 = vmul.f32 %v1641_v36, %v568_v32  ;;  %v3480_v35 = vld [vmem:[%s3961_s10 + $0x220] sm:$0xff]   ;;  %v3481_v36 = vld [vmem:[%s3961_s10 + $0x218] sm:$0xff]  }
 0x7c5   : > { %1658 = vst [vmem:[#allocation2 + $0x4] sm:$0xff] %v4214_v42  ;;  %v1645_v38 = vadd.f32 %v1643_v43, %v569_v34  ;;  %v3482_v43 = vld [vmem:[%s3961_s10 + $0x210] sm:$0xff]  }
 0x7c7   : > { %v4220_v46 = vmul.f32 %v4216_v45, %v1645_v38  ;;  %v3483_v38 = vld [vmem:[%s3961_s10 + $0x208] sm:$0xff]  }
 0x7c9   : > { %1659 = vst [vmem:[#allocation2 + $0x14] sm:$0xff] %v4220_v46  ;;  %v1682_v34 = vpack.c.bf16 %v4220_v46, %v4214_v42 }
 0x7cc   : > { %v1662_v15 = vld [vmem:[#allocation2 + $0x1] sm:$0xff] }
 0x7cd   : > { %v1666_v47 = vld [vmem:[#allocation2 + $0x3] sm:$0xff] }
 0x7ce   : > { %v1660_v48 = vld [vmem:[#allocation2] sm:$0xff] }
 0x7cf   : > { %v1664_v16 = vld [vmem:[#allocation2 + $0x2] sm:$0xff] }
 0x7d0   : > { %v1663_v52 = vld [vmem:[#allocation2 + $0x11] sm:$0xff]  ;;  %v1670_v63 = vld [vmem:[#allocation2 + $0x5] sm:$0xff] }
 0x7d1   : > { %v1667_v53 = vld [vmem:[#allocation2 + $0x13] sm:$0xff]  ;;  %v1679_v54 = vpack.c.bf16 %v1663_v52, %v1662_v15  ;;  %v1674_v1 = vld [vmem:[#allocation2 + $0x7] sm:$0xff] }
 0x7d2   : > { %v1661_v23 = vld [vmem:[#allocation2 + $0x10] sm:$0xff]  ;;  %v1681_v55 = vpack.c.bf16 %v1667_v53, %v1666_v47  ;;  %v1672_v32 = vld [vmem:[#allocation2 + $0x6] sm:$0xff]  ;;  %v1677_v47 = vld [vmem:[#allocation2 + $0x18] sm:$0xff] }
 0x7d3   : > { %v1678_v56 = vpack.c.bf16 %v1661_v23, %v1660_v48  ;;  %v1665_v57 = vld [vmem:[#allocation2 + $0x12] sm:$0xff]  ;;  %2295 = vmatprep.mubr.bf16.mxu1 %v1679_v54  ;;  %v3484_v15 = vld [vmem:[%s3961_s10 + $0x200] sm:$0xff]   ;;  %v1676_v48 = vld [vmem:[#allocation2 + $0x8] sm:$0xff] }
 0x7d4   : > { %v1671_v59 = vld [vmem:[#allocation2 + $0x15] sm:$0xff]  ;;  %v1680_v61 = vpack.c.bf16 %v1665_v57, %v1664_v16  ;;  %2336 = vmatprep.mubr.bf16.mxu0 %v1681_v55  ;;  %v1686_v16 = vpack.c.bf16 %v1677_v47, %v1676_v48  ;;  %v3487_v52 = vld [vmem:[%s3963_s1 + $0x28] sm:$0xff]   ;;  %v3488_v53 = vld [vmem:[%s3963_s1 + $0x20] sm:$0xff]  }
 0x7d5   : > { %v1675_v60 = vld [vmem:[#allocation2 + $0x17] sm:$0xff]  ;;  %2296 = vmatmul.mubr.bf16.vlgmr.msra.gmra.mxu1 %v1678_v56  ;;  %v1683_v3 = vpack.c.bf16 %v1671_v59, %v1670_v63  ;;  %v3491_v55 = vld [vmem:[%s3963_s1 + $0x8] sm:$0xff]   ;;  %v3492_v56 = vld [vmem:[%s3963_s1] sm:$0xff]  }
 0x7d6   : > { %2337 = vmatmul.mubr.bf16.vlgmr.msra.gmra.mxu0 %v1680_v61  ;;  %v1685_v4 = vpack.c.bf16 %v1675_v60, %v1674_v1  ;;  %3073 = vmatpush3.bf16.msra.mxu1 %v3447_v49  ;;  %v1673_v31 = vld [vmem:[#allocation2 + $0x16] sm:$0xff] }
 0x7d7   : > { %3095 = vmatpush3.bf16.msra.mxu0 %v3448_v50  ;;  %2377 = vmatprep.mubr.bf16.mxu1 %v1683_v3  ;;  %v1684_v37 = vpack.c.bf16 %v1673_v31, %v1672_v32  ;;  %v3485_v49 = vld [vmem:[%s3963_s1 + $0x38] sm:$0xff]   ;;  %v3486_v50 = vld [vmem:[%s3963_s1 + $0x30] sm:$0xff]  }
 0x7d8   : > { %2418 = vmatprep.mubr.bf16.mxu0 %v1685_v4  ;;  %3074 = vmatprep.subr.bf16.mxu1 %v3449_v62  ;;  %v3489_v23 = vld [vmem:[%s3963_s1 + $0x18] sm:$0xff]   ;;  %v3490_v54 = vld [vmem:[%s3963_s1 + $0x10] sm:$0xff]  }
 0x7d9   : > { %3096 = vmatprep.subr.bf16.mxu0 %v3450_v2 }
 0x7da   : > { %3075 = vmatpush3.bf16.msra.mxu1 %v3451_v5 }
 0x7db   : > { %3097 = vmatpush3.bf16.msra.mxu0 %v3452_v6  ;;  %3076 = vmatprep.subr.bf16.mxu1 %v3453_v7  ;;  %v570_v7 = vld [vmem:[%s3969_s4 + $0x4] ss:$0 sm:$0xff] }
 0x7dc   : > { %3098 = vmatprep.subr.bf16.mxu0 %v3454_v8 }
 0x7de   : > { %3077 = vmatpush3.bf16.msra.mxu1 %v3455_v9 }
 0x7df   : > { %3099 = vmatpush3.bf16.msra.mxu0 %v3456_v10  ;;  %3078 = vmatprep.subr.bf16.mxu1 %v3457_v11 }
 0x7e0   : > { %3100 = vmatprep.subr.bf16.mxu0 %v3458_v12 }
 0x7e2   : > { %3079 = vmatpush3.bf16.msra.mxu1 %v3459_v13 }
 0x7e3   : > { %3101 = vmatpush3.bf16.msra.mxu0 %v3460_v14  ;;  %3080 = vmatprep.subr.bf16.mxu1 %v3461_v17 }
 0x7e4   : > { %3102 = vmatprep.subr.bf16.mxu0 %v3462_v41 }
 0x7e6   : > { %3081 = vmatpush3.bf16.msra.mxu1 %v3463_v18 }
 0x7e7   : > { %3103 = vmatpush3.bf16.msra.mxu0 %v3464_v19  ;;  %3082 = vmatprep.subr.bf16.mxu1 %v3465_v0 }
 0x7e8   : > { %3104 = vmatprep.subr.bf16.mxu0 %v3466_v51 }
 0x7ea   : > { %3083 = vmatpush3.bf16.msra.mxu1 %v3467_v44 }
 0x7eb   : > { %3105 = vmatpush3.bf16.msra.mxu0 %v3468_v20  ;;  %3084 = vmatprep.subr.bf16.mxu1 %v3469_v21 }
 0x7ec   : > { %3106 = vmatprep.subr.bf16.mxu0 %v3470_v58 }
 0x7ee   : > { %3085 = vmatpush3.bf16.msra.mxu1 %v3471_v22 }
 0x7ef   : > { %3107 = vmatpush3.bf16.msra.mxu0 %v3472_v24  ;;  %3086 = vmatprep.subr.bf16.mxu1 %v3473_v25 }
 0x7f0   : > { %3108 = vmatprep.subr.bf16.mxu0 %v3474_v28 }
 0x7f2   : > { %3087 = vmatpush3.bf16.msra.mxu1 %v3475_v29 }
 0x7f3   : > { %3109 = vmatpush3.bf16.msra.mxu0 %v3476_v30  ;;  %3182 = vmatprep.subr.bf16.mxu1 %v3756_v39 }
 0x7f4   : > { %3202 = vmatprep.subr.bf16.mxu0 %v3756_v39 }
 0x7f5   : > { %2378 = vmatmul.mubr.bf16.vlgmr.msra.gmra.mxu1 %v1682_v34 }
 0x7f6   : > { %2419 = vmatmul.mubr.bf16.vlgmr.msra.gmra.mxu0 %v1684_v37  ;;  %3183 = vmatpush3.bf16.msra.mxu1 %v3477_v33 }
 0x7f7   : > { %3198 = vmatprep.mubr.msk.bf16.mxu1 %vm3757_vm0, %v3756_v39  ;;  %3184 = vmatprep.subr.bf16.mxu1 %v3756_v39 }
 0x7f8   : > { %3218 = vmatprep.mubr.msk.bf16.mxu0 %vm3757_vm0, %v3756_v39  ;;  %3203 = vmatpush3.bf16.msra.mxu0 %v3485_v49 }
 0x7f9   : > { %3204 = vmatprep.subr.bf16.mxu0 %v3756_v39 }
 0x7fa   : > { %3185 = vmatpush3.bf16.msra.mxu1 %v3478_v40  ;;  %v571_v40 = vld [vmem:[%s3969_s4 + $0x5] ss:$0 sm:$0xff] }
 0x7fb   : > { %3186 = vmatprep.subr.bf16.mxu1 %v3756_v39 }
 0x7fc   : > { %3205 = vmatpush3.bf16.msra.mxu0 %v3486_v50 }
 0x7fd   : > { %3206 = vmatprep.subr.bf16.mxu0 %v3756_v39 }
 0x7fe   : > { %3187 = vmatpush3.bf16.msra.mxu1 %v3479_v26 }
 0x7ff   : > { %3188 = vmatprep.subr.bf16.mxu1 %v3756_v39 }
 0x800   : > { %3207 = vmatpush3.bf16.msra.mxu0 %v3487_v52 }
 0x801   : > { %3208 = vmatprep.subr.bf16.mxu0 %v3756_v39 }
 0x802   : > { %3189 = vmatpush3.bf16.msra.mxu1 %v3480_v35 }
 0x803   : > { %3190 = vmatprep.subr.bf16.mxu1 %v3756_v39 }
 0x804   : > { %3209 = vmatpush3.bf16.msra.mxu0 %v3488_v53 }
 0x805   : > { %3210 = vmatprep.subr.bf16.mxu0 %v3756_v39 }
 0x806   : > { %3191 = vmatpush3.bf16.msra.mxu1 %v3481_v36 }
 0x807   : > { %3192 = vmatprep.subr.bf16.mxu1 %v3756_v39 }
 0x808   : > { %3211 = vmatpush3.bf16.msra.mxu0 %v3489_v23 }
 0x809   : > { %3212 = vmatprep.subr.bf16.mxu0 %v3756_v39 }
 0x80a   : > { %3193 = vmatpush3.bf16.msra.mxu1 %v3482_v43 }
 0x80b   : > { %3194 = vmatprep.subr.bf16.mxu1 %v3756_v39 }
 0x80c   : > { %3213 = vmatpush3.bf16.msra.mxu0 %v3490_v54 }
 0x80d   : > { %3214 = vmatprep.subr.bf16.mxu0 %v3756_v39 }
 0x80e   : > { %3195 = vmatpush3.bf16.msra.mxu1 %v3483_v38 }
 0x80f   : > { %3196 = vmatprep.subr.bf16.mxu1 %v3756_v39 }
 0x810   : > { %3215 = vmatpush3.bf16.msra.mxu0 %v3491_v55 }
 0x811   : > { %3216 = vmatprep.subr.bf16.mxu0 %v3756_v39 }
 0x812   : > { %3197 = vmatpush3.bf16.msra.mxu1 %v3484_v15 }
 0x814   : > { %3217 = vmatpush3.bf16.msra.mxu0 %v3492_v56 }
 0x815   : > { %3199 = vmatmul.mubr.bf16.vlgmr.msra.gmra.mxu1 %v1686_v16 }
 0x895   : > { %v3044_v57 = vpop.f32.mrf.mxu1 }
 0x896   : > { %v3066_v60 = vpop.f32.mrf.mxu0 }
 0x897   : > { %v3045_v59 = vpop.f32.mrf.mxu1 }
 0x898   : > { %v3067_v62 = vpop.f32.mrf.mxu0  ;;  %v3046_v6 = vadd.f32 %v3045_v59, %v3044_v57 }
 0x899   : > { %v3047_v61 = vpop.f32.mrf.mxu1  ;;  %v3068_v12 = vadd.f32 %v3067_v62, %v3066_v60 }
 0x89a   : > { %v3069_v1 = vpop.f32.mrf.mxu0  ;;  %v2298_v11 = vadd.f32 %v3046_v6, %v570_v7  ;;  %v573_v6 = vld [vmem:[%s3969_s4 + $0x7] ss:$0 sm:$0xff] }
 0x89b   : > { %v3048_v63 = vpop.f32.mrf.mxu1 }
 0x89c   : > { %v3070_v3 = vpop.f32.mrf.mxu0  ;;  %v3049_v9 = vadd.f32 %v3048_v63, %v3047_v61  ;;  %v2339_v41 = vadd.f32 %v3068_v12, %v2298_v11 }
 0x89d   : > { %v3071_v18 = vadd.f32 %v3070_v3, %v3069_v1 }
 0x89e   : > { %v2301_v13 = vadd.f32 %v3049_v9, %v570_v7 }
 0x8a0   : > { %v2342_v0 = vadd.f32 %v3071_v18, %v2301_v13 }
 0x8b5   : > { %v3088_v2 = vpop.f32.mrf.mxu1 }
 0x8b6   : > { %v3110_v5 = vpop.f32.mrf.mxu0 }
 0x8b7   : > { %v3089_v4 = vpop.f32.mrf.mxu1 }
 0x8b8   : > { %v3111_v10 = vpop.f32.mrf.mxu0  ;;  %v3090_v14 = vadd.f32 %v3089_v4, %v3088_v2  ;;  %v572_v4 = vld [vmem:[%s3969_s4 + $0x6] ss:$0 sm:$0xff] }
 0x8b9   : > { %v3091_v8 = vpop.f32.mrf.mxu1  ;;  %v3112_v20 = vadd.f32 %v3111_v10, %v3110_v5 }
 0x8ba   : > { %v3113_v17 = vpop.f32.mrf.mxu0  ;;  %v2380_v51 = vadd.f32 %v3090_v14, %v2339_v41 }
 0x8bb   : > { %v3092_v39 = vpop.f32.mrf.mxu1 }
 0x8bc   : > { %v3093_v19 = vadd.f32 %v3092_v39, %v3091_v8  ;;  %v3114_v44 = vpop.f32.mrf.mxu0  ;;  %v2421_v24 = vadd.f32 %v3112_v20, %v2380_v51 }
 0x8bd   : > { %v3115_v22 = vadd.f32 %v3114_v44, %v3113_v17 }
 0x8be   : > { %v2383_v21 = vadd.f32 %v3093_v19, %v2342_v0 }
 0x8c0   : > { %v2424_v29 = vadd.f32 %v3115_v22, %v2383_v21 }
 0x8d5   : > { %v2461_v58 = vpop.f32.mrf.mxu1 }
 0x8d6   : > { %v2462_v28 = vadd.f32 %v2461_v58, %v2421_v24 }
 0x8d7   : > { %v3200_v25 = vpop.f32.mrf.mxu1 }
 0x8d8   : > { %v2468_v33 = vmax.f32 %v2462_v28, 0.0 }
 0x8d9   : > { %v2464_v30 = vpop.f32.mrf.mxu1 }
 0x8da   : > { %v2465_v31 = vadd.f32 %v2464_v30, %v2424_v29 }
 0x8db   : > { %v3201_v32 = vpop.f32.mrf.mxu1 }
 0x8dc   : > { %v2469_v34 = vmax.f32 %v2465_v31, 0.0 }
 0x8de   : > { %v2470_v37 = vpack.c.bf16 %v2469_v34, %v2468_v33 }
 0x8e0   : > { %3219 = vmatmul.mubr.bf16.vlgmr.msra.gmra.mxu0 %v2470_v37 }
 0x9a0   : > { %v2569_v26 = vpop.f32.mrf.mxu0 }
 0x9a1   : > { %v2570_v35 = vadd.f32 %v2569_v26, %v571_v40 }
 0x9a2   : > { %v3220_v36 = vpop.f32.mrf.mxu0 }
 0x9a3   : > { %v2576_v43 = vadd.f32 %v2570_v35, %v4214_v42 }
 0x9a4   : > { %v2572_v38 = vpop.f32.mrf.mxu0 }
 0x9a5   : > { %v2573_v15 = vadd.f32 %v2572_v38, %v571_v40  ;;  %2578 = vadd.xlane.f32.xlu1 %v2576_v43  ;;  %v2584_v16 = vmul.f32 %v2576_v43, %v2576_v43 }
 0x9a6   : > { %v3221_v47 = vpop.f32.mrf.mxu0 }
 0x9a7   : > { %v2577_v48 = vadd.f32 %v2573_v15, %v4220_v46 }
 0x9a9   : > { %2586 = vadd.xlane.f32.xlu1 %v2584_v16  ;;  %2580 = vadd.xlane.f32.xlu0 %v2577_v48  ;;  %v2585_v49 = vmul.f32 %v2577_v48, %v2577_v48 }
 0x9ad   : > { %2588 = vadd.xlane.f32.xlu1 %v2585_v49 }
 0xa2e   : > { %v2579_v50 = vpop.xlane.xlu1 %2578 }
 0xa2f   : > { %v2582_v52 = vmul.f32 0.03125, %v2579_v50 }
 0xa31   : > { %v2592_v54 = vmul.f32 %v2582_v52, %v2582_v52  ;;  %v2598_v2 = vsub.f32 %v2576_v43, %v2582_v52 }
 0xa32   : > { %v2587_v53 = vpop.xlane.xlu1 %2586  ;;  %v2581_v23 = vpop.xlane.xlu0 %2580 }
 0xa33   : > { %v2590_v55 = vmul.f32 0.03125, %v2587_v53  ;;  %v2583_v56 = vmul.f32 0.03125, %v2581_v23 }
 0xa35   : > { %v2594_v42 = vsub.f32 %v2590_v55, %v2592_v54  ;;  %v2593_v60 = vmul.f32 %v2583_v56, %v2583_v56  ;;  %v2599_v7 = vsub.f32 %v2577_v48, %v2583_v56 }
 0xa36   : > { %v2589_v57 = vpop.xlane.xlu1 %2588 }
 0xa37   : > { %v2596_v59 = vmax.f32 %v2594_v42, 0.0  ;;  %v2591_v61 = vmul.f32 0.03125, %v2589_v57 }
 0xa39   : > { %v2600_v46 = vadd.f32 1e-05, %v2596_v59  ;;  %v2595_v62 = vsub.f32 %v2591_v61, %v2593_v60 }
 0xa3b   : > { %3513 = vrsqrt.f32 %v2600_v46  ;;  %v2597_v63 = vmax.f32 %v2595_v62, 0.0 }
 0xa3d   : > { %v2601_v1 = vadd.f32 1e-05, %v2597_v63 }
 0xa3f   : > { %3515 = vrsqrt.f32 %v2601_v1 }
 0xa48   : > { %v3514_v3 = vpop.eup %3513 }
 0xa49   : > { %v2604_v5 = vmul.f32 %v3514_v3, %v2598_v2 }
 0xa4b   : > { %v2606_v8 = vmul.f32 %v2604_v5, %v572_v4 }
 0xa4c   : > { %v3516_v9 = vpop.eup %3515 }
 0xa4d   : > { %v2605_v10 = vmul.f32 %v3516_v9, %v2599_v7  ;;  %v2608_v11 = vadd.f32 %v2606_v8, %v573_v6 }
 0xa4f   : > { %v2607_v39 = vmul.f32 %v2605_v10, %v572_v4  ;;  %v2610_v12 = vmul.f32 %v2608_v11, %v4211_v27 }
 0xa51   : > { %v2609_v13 = vadd.f32 %v2607_v39, %v573_v6  ;;  %2612 = vst [vmem:[#allocation12] sm:$0xff] %v2610_v12 }
 0xa53   : > { %v2611_v14 = vmul.f32 %v2609_v13, %v4216_v45 }
 0xa55   : > { %2613 = vst [vmem:[#allocation12 + $0x8] sm:$0xff] %v2611_v14 }
 0xa56   : > { %3670 = shalt.err (!%p3667_p13)
}
 0xa57   : > { %s3759_s10 = smov 128   ;;  %s3760_s20 = smov 8  }
 0xa58   : > { %s4376_s4 = sld [smem:[#allocation28_spill]] }
 0xa5e   : > { %3242 = dma.vmem_to_hbm [thread:$0]  (%p3262_p7), %s2624_s21, 256, %s4376_s4, [#allocation5], %s3759_s10, %s3759_s10, %s3760_s20  }
 0xa5f   : > { %3718 = dma.done.wait (%p3262_p7), [#allocation5], 256  }
 0xa60   : > { %3720 = vsyncadd (%p3262_p7), [#allocation5], 4294967040 }
 0xa61 PF: > { %s4377_s17 = sld [smem:[#allocation19_spill]]  ;;  %s4381_s27 = smov %s3727_s28 }
 0xa62   : > { %s4378_s14 = sld [smem:[#allocation17_spill]]  ;;  %s4383_s30 = smov %s3739_s9 }
 0xa63   : > { %s4379_s29 = sld [smem:[#allocation21_spill]] }
 0xa64   : > { %s4380_s23 = sld [smem:[#allocation20_spill]] }
 0xa67   : > { %s28_s10 = sadd.s32 1, %s4377_s17  }
 0xa68   : > { %p25_p10 = scmp.ge.s32.totalorder %s28_s10, 4   ;;  %s4382_s28 = smov %s4378_s14 }
 0xa6a   : > { %s4384_s9 = smov %s4380_s23  ;;  %27 = sbr.rel (!%p25_p10) target bundleno = 17 (0x11), region = 151 }
 0xa6f   :  { %2639 = vsyncpa [#allocation4], 1 }
 0xa70   :  { %2641 = vsyncpa [#allocation4 + $0x1], 1 }
 0xa71   :  { %2642 = vsyncpa [#allocation7], 1 }
 0xa72   :  { %2644 = vsyncpa [#allocation7 + $0x1], 1 }
 0xa73   :  { %2645 = vsyncpa [#allocation10], 1 }
 0xa74   :  { %2647 = vsyncpa [#allocation10 + $0x1], 1 }
 0xa75   :  { %2648 = vsyncpa [#allocation5], 1 }
 0xa76   :  { %2650 = vsyncpa [#allocation5 + $0x1], 1 }

</bundles_post_ra>
